<compile_context>
chip_gen: v7x
topology: tpu7x:2x2x1
jax: 0.10.0
libtpu: 0.0.40
codegen_flags: <defaults>
</compile_context>

<pallas_src>
import jax
import jax.numpy as jnp
from jax.experimental import pallas as pl
from jax.experimental.pallas import tpu as pltpu

# ---------------- configuration (small, synthetic) ----------------
DIM = 32                   # cfg.MODEL.ROI_BOX_HEAD.MLP_HEAD_DIM (2048 in real cfg)
HIDDEN = 3 * DIM // 2      # rel_embedding hidden dim (48 here)
NUM_REL_CLASSES = 16       # cfg.MODEL.ROI_RELATION_HEAD.NUM_CLASSES
NUM_OBJ_CLASSES = 10       # object label vocabulary for the frequency bias
SPT_DIM = 64               # rel_spt_predictor input dim (fixed to 64 in module)
POOL_H = POOL_W = 4        # spatial size of x_pred before AdaptiveAvgPool2d(1)

HIDDEN_PAD = 128           # lane-dense padding of HIDDEN (48 -> 128)
DIM_PAD = 128              # lane-dense padding of DIM for x_rel / w_pred K
NC_PAD = 128               # class dim padded to a full lane tile (dense stores)
TR = 512                   # relation-pair tile per grid step (HBM-roofline sized)


def _leaky_relu(x, slope=0.1):
    # nn.LeakyReLU(0.1) in the reference RelDN.
    return jnp.where(x > 0, x, slope * x)


def _reldn_kernel(sub_ref, xp_ref, obj_ref, spt_ref,
                  w1s_ref, w1p_ref, w1o_ref, b1_ref,
                  w2_ref, b2_ref,
                  wsub_ref, wobj_ref, wspt_ref, wpred_ref, ball_ref,
                  out_ref):
    """Fused RelDN relation scoring for one tile of TR relation pairs.

    Activations and weights arrive as bf16 (halved DMA bytes); every matmul
    accumulates in f32 on the MXU.  Padded HIDDEN/DIM/class columns are exactly
    zero by construction (zero weight columns + zero bias + LeakyReLU(0)=0).
    """
    f32 = jnp.float32
    bf16 = jnp.bfloat16

    sub = sub_ref[...]          # (TR, DIM)     bf16
    xp = xp_ref[...]            # (TR, DIM)     bf16
    obj = obj_ref[...]          # (TR, DIM)     bf16
    spt = spt_ref[...]          # (TR, SPT_DIM) bf16

    # rel_embedding: Linear(3*DIM -> HIDDEN) + LeakyReLU(0.1), computed as
    # three K=DIM contractions against the row blocks of w1 (no concat slab).
    h1 = (jnp.dot(sub, w1s_ref[...], preferred_element_type=f32)
          + jnp.dot(xp, w1p_ref[...], preferred_element_type=f32)
          + jnp.dot(obj, w1o_ref[...], preferred_element_type=f32)
          + b1_ref[...])
    h1 = _leaky_relu(h1).astype(bf16)                       # (TR, HIDDEN_PAD)

    # rel_embedding: Linear(HIDDEN -> DIM) + LeakyReLU(0.1)
    x_rel = _leaky_relu(
        jnp.dot(h1, w2_ref[...], preferred_element_type=f32)
        + b2_ref[...]).astype(bf16)                         # (TR, DIM_PAD)

    # rel_subj / rel_obj / rel_spt / rel_pred predictors + summed biases.
    logits = (jnp.dot(sub, wsub_ref[...], preferred_element_type=f32)
              + jnp.dot(obj, wobj_ref[...], preferred_element_type=f32)
              + jnp.dot(spt, wspt_ref[...], preferred_element_type=f32)
              + jnp.dot(x_rel, wpred_ref[...], preferred_element_type=f32)
              + ball_ref[...])
    out_ref[...] = logits                                    # (TR, NC_PAD) f32


def _pad_rows(x, rows):
    pad = rows - x.shape[0]
    if pad == 0:
        return x
    return jnp.concatenate([x, jnp.zeros((pad,) + x.shape[1:], x.dtype)], axis=0)


def _pack_kernel_params(params):
    """Zero-pad per-branch weights to lane-dense shapes and cast to bf16."""
    bf16 = jnp.bfloat16
    pad_h = HIDDEN_PAD - HIDDEN
    pad_d = DIM_PAD - DIM
    pad_c = NC_PAD - NUM_REL_CLASSES

    padH = lambda w: jnp.pad(w, ((0, 0), (0, pad_h)))
    padC = lambda w: jnp.pad(w, ((0, 0), (0, pad_c)))

    w1s = padH(params["w1_sub"]).astype(bf16)                # (DIM, HIDDEN_PAD)
    w1p = padH(params["w1_pred"]).astype(bf16)
    w1o = padH(params["w1_obj"]).astype(bf16)
    b1 = jnp.pad(params["b1"], ((0, 0), (0, pad_h)))         # (1, HIDDEN_PAD) f32

    w2 = jnp.pad(params["w2"],
                 ((0, pad_h), (0, pad_d))).astype(bf16)      # (HIDDEN_PAD, DIM_PAD)
    b2 = jnp.pad(params["b2"], ((0, 0), (0, pad_d)))         # (1, DIM_PAD) f32

    wsub = padC(params["w_subj"]).astype(bf16)               # (DIM, NC_PAD)
    wobj = padC(params["w_obj"]).astype(bf16)                # (DIM, NC_PAD)
    wspt = padC(params["w_spt"]).astype(bf16)                # (SPT_DIM, NC_PAD)
    wpred = jnp.pad(params["w_pred"],
                    ((0, pad_d), (0, pad_c))).astype(bf16)   # (DIM_PAD, NC_PAD)
    ball = padC(params["b_subj"] + params["b_obj"]
                + params["b_spt"] + params["b_pred"])        # (1, NC_PAD) f32
    return (w1s, w1p, w1o, b1, w2, b2, wsub, wobj, wspt, wpred, ball)


def reldn_rel_logits(sub_vert, x_pred_pooled, obj_vert, edge_spt_feats,
                     rel_sem_logits, params):
    """Fused relation-class logits via the Pallas kernel.

    sub_vert, obj_vert, x_pred_pooled : (R, DIM)      float32
    edge_spt_feats                    : (R, SPT_DIM)  float32
    rel_sem_logits                    : (R, NUM_REL_CLASSES) float32
    """
    R = sub_vert.shape[0]
    r_pad = ((R + TR - 1) // TR) * TR
    bf16 = jnp.bfloat16

    # Activations streamed to the kernel as bf16 (halved HBM bytes); no concat.
    sub = _pad_rows(sub_vert.astype(bf16), r_pad)
    xp = _pad_rows(x_pred_pooled.astype(bf16), r_pad)
    obj = _pad_rows(obj_vert.astype(bf16), r_pad)
    spt = _pad_rows(edge_spt_feats.astype(bf16), r_pad)

    weights = _pack_kernel_params(params)

    grid = (r_pad // TR,)
    row_spec = lambda cols: pl.BlockSpec((TR, cols), lambda i: (i, 0))
    full_spec = lambda r, c: pl.BlockSpec((r, c), lambda i: (0, 0))

    in_specs = [
        row_spec(DIM),                      # sub_vert
        row_spec(DIM),                      # x_pred (pooled)
        row_spec(DIM),                      # obj_vert
        row_spec(SPT_DIM),                  # spatial features
        full_spec(DIM, HIDDEN_PAD),         # w1_sub
        full_spec(DIM, HIDDEN_PAD),         # w1_pred
        full_spec(DIM, HIDDEN_PAD),         # w1_obj
        full_spec(1, HIDDEN_PAD),           # b1
        full_spec(HIDDEN_PAD, DIM_PAD),     # w2
        full_spec(1, DIM_PAD),              # b2
        full_spec(DIM, NC_PAD),             # w_subj
        full_spec(DIM, NC_PAD),             # w_obj
        full_spec(SPT_DIM, NC_PAD),         # w_spt
        full_spec(DIM_PAD, NC_PAD),         # w_pred
        full_spec(1, NC_PAD),               # b_all (sum of the four biases)
    ]
    out_spec = pl.BlockSpec((TR, NC_PAD), lambda i: (i, 0))

    out = pl.pallas_call(
        _reldn_kernel,
        out_shape=jax.ShapeDtypeStruct((r_pad, NC_PAD), jnp.float32),
        grid_spec=pl.GridSpec(grid=grid, in_specs=in_specs, out_specs=out_spec),
        compiler_params=pltpu.CompilerParams(
            dimension_semantics=("parallel",),
            vmem_limit_bytes=32 * 1024 * 1024),
    )(sub, xp, obj, spt, *weights)

    # Frequency-bias (semantic) logits added post-kernel in f32 on the 16 real
    # class columns only — avoids streaming an 8x zero-padded slab through HBM.
    return out[:R, :NUM_REL_CLASSES] + rel_sem_logits


def init_params(key):
    """Deterministic synthetic parameters (shapes follow RelDN.__init__)."""
    ks = jax.random.split(key, 16)
    s = 0.05
    f32 = jnp.float32
    return {
        # rel_embedding: Linear(3*DIM, HIDDEN) stored as its 3 input row blocks.
        "w1_sub":  s * jax.random.normal(ks[0], (DIM, HIDDEN), f32),
        "w1_pred": s * jax.random.normal(ks[1], (DIM, HIDDEN), f32),
        "w1_obj":  s * jax.random.normal(ks[2], (DIM, HIDDEN), f32),
        "b1":      s * jax.random.normal(ks[3], (1, HIDDEN), f32),
        # rel_embedding: Linear(HIDDEN, DIM)
        "w2":      s * jax.random.normal(ks[4], (HIDDEN, DIM), f32),
        "b2":      s * jax.random.normal(ks[5], (1, DIM), f32),
        # rel_subj_predictor / rel_obj_predictor / rel_pred_predictor
        "w_subj":  s * jax.random.normal(ks[6], (DIM, NUM_REL_CLASSES), f32),
        "b_subj":  s * jax.random.normal(ks[7], (1, NUM_REL_CLASSES), f32),
        "w_obj":   s * jax.random.normal(ks[8], (DIM, NUM_REL_CLASSES), f32),
        "b_obj":   s * jax.random.normal(ks[9], (1, NUM_REL_CLASSES), f32),
        "w_pred":  s * jax.random.normal(ks[10], (DIM, NUM_REL_CLASSES), f32),
        "b_pred":  s * jax.random.normal(ks[11], (1, NUM_REL_CLASSES), f32),
        # rel_spt_predictor: Linear(64, NUM_REL_CLASSES)
        "w_spt":   s * jax.random.normal(ks[12], (SPT_DIM, NUM_REL_CLASSES), f32),
        "b_spt":   s * jax.random.normal(ks[13], (1, NUM_REL_CLASSES), f32),
        # freq_dist -> pred_dist = log(freq + 0.001)  (FrequencyBias table)
        "pred_dist": jnp.log(
            jax.random.uniform(ks[14], (NUM_OBJ_CLASSES, NUM_OBJ_CLASSES,
                                        NUM_REL_CLASSES), f32) + 0.001),
    }


def reldn_forward(params, box_features_per_img, labels_per_img,
                  idx_pairs_per_img, x_pred_4d, edge_spt_feats):
    """Mirrors RelDN.forward.  Gathers / offsets / pooling stay in JAX; the
    dense relation-scoring path runs in the fused Pallas kernel."""
    rel_inds, sub_vert, obj_vert, subj_lab, obj_lab, all_labels = [], [], [], [], [], []
    offset = 0
    for feats, labels, idx_pairs in zip(box_features_per_img, labels_per_img,
                                        idx_pairs_per_img):
        rel_inds.append(idx_pairs + offset)
        offset += feats.shape[0]
        sub_vert.append(feats[idx_pairs[:, 0]])
        obj_vert.append(feats[idx_pairs[:, 1]])
        subj_lab.append(labels[idx_pairs[:, 0]])
        obj_lab.append(labels[idx_pairs[:, 1]])
        all_labels.append(labels)
    rel_inds = jnp.concatenate(rel_inds, axis=0)
    sub_vert = jnp.concatenate(sub_vert, axis=0)
    obj_vert = jnp.concatenate(obj_vert, axis=0)
    subj_lab = jnp.concatenate(subj_lab, axis=0)
    obj_lab = jnp.concatenate(obj_lab, axis=0)
    obj_class_labels = jnp.concatenate(all_labels, axis=0)

    # FrequencyBias.index_with_labels: log-frequency table lookup (gather).
    rel_sem_logits = params["pred_dist"][subj_lab, obj_lab]   # (R, NUM_REL_CLASSES)

    # AdaptiveAvgPool2d(1): the module returns this pooled tensor and feeds it
    # to rel_embedding, so pool once here and reuse for both.
    R = x_pred_4d.shape[0]
    x_pred_pooled = jnp.mean(
        x_pred_4d.reshape(R, DIM, POOL_H * POOL_W), axis=-1)  # (R, DIM) f32

    rel_class_logits = reldn_rel_logits(sub_vert, x_pred_pooled, obj_vert,
                                        edge_spt_feats, rel_sem_logits, params)

    x_obj = None
    obj_class_logits = None
    return ((x_obj, x_pred_pooled), obj_class_logits, rel_class_logits,
            obj_class_labels, rel_inds)


def _reference_logits(params, sub, xpool, obj, spt, sem):
    """Pure-JAX f32 reference of the RelDN scoring path (for validation)."""
    hp = jax.lax.Precision.HIGHEST
    w1 = jnp.concatenate([params["w1_sub"], params["w1_pred"], params["w1_obj"]], 0)
    xin = jnp.concatenate([sub, xpool, obj], axis=1)
    h1 = _leaky_relu(jnp.dot(xin, w1, precision=hp) + params["b1"])
    x_rel = _leaky_relu(jnp.dot(h1, params["w2"], precision=hp) + params["b2"])
    return (jnp.dot(x_rel, params["w_pred"], precision=hp) + params["b_pred"]
            + jnp.dot(sub, params["w_subj"], precision=hp) + params["b_subj"]
            + jnp.dot(obj, params["w_obj"], precision=hp) + params["b_obj"]
            + jnp.dot(spt, params["w_spt"], precision=hp) + params["b_spt"]
            + sem)


if __name__ == "__main__":
    key = jax.random.PRNGKey(0)
    k_par, k_feat, k_lab, k_pair, k_xp, k_spt = jax.random.split(key, 6)

    params = init_params(k_par)

    # Two images, 16 proposals each, 512 relation pairs each (R = 1024 = 2*TR,
    # so the grid has two parallel 512-row steps -> both v7x TensorCores get
    # work and each step is HBM-roofline sized on v5e/v6e).
    n_imgs, n_boxes, n_pairs = 2, 16, 512
    fk = jax.random.split(k_feat, n_imgs)
    lk = jax.random.split(k_lab, n_imgs)
    pk = jax.random.split(k_pair, n_imgs)
    box_features_per_img = [
        jax.random.normal(fk[i], (n_boxes, DIM), jnp.float32) for i in range(n_imgs)]
    labels_per_img = [
        jax.random.randint(lk[i], (n_boxes,), 1, NUM_OBJ_CLASSES) for i in range(n_imgs)]
    idx_pairs_per_img = [
        jax.random.randint(pk[i], (n_pairs, 2), 0, n_boxes) for i in range(n_imgs)]

    R = n_imgs * n_pairs
    # Synthesized outputs of pred_feature_extractor (NCHW) and rel_spatial_feat.
    x_pred_4d = jax.random.normal(k_xp, (R, DIM, POOL_H, POOL_W), jnp.float32)
    edge_spt_feats = jax.random.normal(k_spt, (R, SPT_DIM), jnp.float32)

    out = reldn_forward(params, box_features_per_img, labels_per_img,
                        idx_pairs_per_img, x_pred_4d, edge_spt_feats)
    (_, x_pred_pooled), _, rel_class_logits, obj_class_labels, rel_inds = out
    jax.block_until_ready(rel_class_logits)

    assert rel_class_logits.shape == (R, NUM_REL_CLASSES)
    assert x_pred_pooled.shape == (R, DIM)
    assert obj_class_labels.shape == (n_imgs * n_boxes,)
    assert rel_inds.shape == (R, 2)

    # Numerical check of the fused (bf16-operand) kernel against an f32 ref.
    sub_ref = jnp.concatenate([f[p[:, 0]] for f, p in
                               zip(box_features_per_img, idx_pairs_per_img)], 0)
    obj_ref = jnp.concatenate([f[p[:, 1]] for f, p in
                               zip(box_features_per_img, idx_pairs_per_img)], 0)
    subj_lab = jnp.concatenate([l[p[:, 0]] for l, p in
                                zip(labels_per_img, idx_pairs_per_img)], 0)
    obj_lab = jnp.concatenate([l[p[:, 1]] for l, p in
                               zip(labels_per_img, idx_pairs_per_img)], 0)
    sem_ref = params["pred_dist"][subj_lab, obj_lab]
    ref = _reference_logits(params, sub_ref, x_pred_pooled, obj_ref,
                            edge_spt_feats, sem_ref)
    # Tolerance loosened for bf16 MXU operands (f32 accumulation).
    assert jnp.allclose(rel_class_logits, ref, atol=5e-2, rtol=5e-2), \
        "kernel output does not match reference"

    print("KERNEL_OK")
</pallas_src>

<mosaic_0001>
module attributes {stable_mosaic.version = 11 : i64} {
  func.func @_reldn_kernel(%arg0: i32, %arg1: memref<512x32xbf16, #tpu.memory_space<vmem>>, %arg2: memref<512x32xbf16, #tpu.memory_space<vmem>>, %arg3: memref<512x32xbf16, #tpu.memory_space<vmem>>, %arg4: memref<512x64xbf16, #tpu.memory_space<vmem>>, %arg5: memref<32x128xbf16, #tpu.memory_space<vmem>>, %arg6: memref<32x128xbf16, #tpu.memory_space<vmem>>, %arg7: memref<32x128xbf16, #tpu.memory_space<vmem>>, %arg8: memref<1x128xf32, #tpu.memory_space<vmem>>, %arg9: memref<128x128xbf16, #tpu.memory_space<vmem>>, %arg10: memref<1x128xf32, #tpu.memory_space<vmem>>, %arg11: memref<32x128xbf16, #tpu.memory_space<vmem>>, %arg12: memref<32x128xbf16, #tpu.memory_space<vmem>>, %arg13: memref<64x128xbf16, #tpu.memory_space<vmem>>, %arg14: memref<128x128xbf16, #tpu.memory_space<vmem>>, %arg15: memref<1x128xf32, #tpu.memory_space<vmem>>, %arg16: memref<512x128xf32, #tpu.memory_space<vmem>>) attributes {dimension_semantics = [#tpu.dimension_semantics<parallel>], iteration_bounds = array<i64: 2>, scalar_prefetch = 0 : i64, scratch_operands = 0 : i64, tpu.core_type = #tpu.core_type<tc>, window_params = [{transform_indices = @transform_0, window_bounds = array<i64: 512, 32>}, {transform_indices = @transform_1, window_bounds = array<i64: 512, 32>}, {transform_indices = @transform_2, window_bounds = array<i64: 512, 32>}, {transform_indices = @transform_3, window_bounds = array<i64: 512, 64>}, {pipeline_mode = #tpu.pipeline_mode<synchronous>, transform_indices = @transform_4, window_bounds = array<i64: 32, 128>}, {pipeline_mode = #tpu.pipeline_mode<synchronous>, transform_indices = @transform_5, window_bounds = array<i64: 32, 128>}, {pipeline_mode = #tpu.pipeline_mode<synchronous>, transform_indices = @transform_6, window_bounds = array<i64: 32, 128>}, {pipeline_mode = #tpu.pipeline_mode<synchronous>, transform_indices = @transform_7, window_bounds = array<i64: 1, 128>}, {pipeline_mode = #tpu.pipeline_mode<synchronous>, transform_indices = @transform_8, window_bounds = array<i64: 128, 128>}, {pipeline_mode = #tpu.pipeline_mode<synchronous>, transform_indices = @transform_9, window_bounds = array<i64: 1, 128>}, {pipeline_mode = #tpu.pipeline_mode<synchronous>, transform_indices = @transform_10, window_bounds = array<i64: 32, 128>}, {pipeline_mode = #tpu.pipeline_mode<synchronous>, transform_indices = @transform_11, window_bounds = array<i64: 32, 128>}, {pipeline_mode = #tpu.pipeline_mode<synchronous>, transform_indices = @transform_12, window_bounds = array<i64: 64, 128>}, {pipeline_mode = #tpu.pipeline_mode<synchronous>, transform_indices = @transform_13, window_bounds = array<i64: 128, 128>}, {pipeline_mode = #tpu.pipeline_mode<synchronous>, transform_indices = @transform_14, window_bounds = array<i64: 1, 128>}, {transform_indices = @transform_15, window_bounds = array<i64: 512, 128>}]} {
    %c0 = arith.constant 0 : index
    %c0_0 = arith.constant 0 : index
    %0 = vector.load %arg1[%c0, %c0_0] : memref<512x32xbf16, #tpu.memory_space<vmem>>, vector<512x32xbf16>
    %c0_1 = arith.constant 0 : index
    %c0_2 = arith.constant 0 : index
    %1 = vector.load %arg2[%c0_1, %c0_2] : memref<512x32xbf16, #tpu.memory_space<vmem>>, vector<512x32xbf16>
    %c0_3 = arith.constant 0 : index
    %c0_4 = arith.constant 0 : index
    %2 = vector.load %arg3[%c0_3, %c0_4] : memref<512x32xbf16, #tpu.memory_space<vmem>>, vector<512x32xbf16>
    %c0_5 = arith.constant 0 : index
    %c0_6 = arith.constant 0 : index
    %3 = vector.load %arg4[%c0_5, %c0_6] : memref<512x64xbf16, #tpu.memory_space<vmem>>, vector<512x64xbf16>
    %c0_7 = arith.constant 0 : index
    %c0_8 = arith.constant 0 : index
    %4 = vector.load %arg5[%c0_7, %c0_8] : memref<32x128xbf16, #tpu.memory_space<vmem>>, vector<32x128xbf16>
    %cst = arith.constant dense<0.000000e+00> : vector<512x128xf32>
    %5 = tpu.matmul %0, %4, %cst {dimension_numbers = #tpu.dot_dimension_numbers<[1], [0], [0], [1], [0, 0, 1, 1], [], []>} : vector<512x32xbf16>, vector<32x128xbf16>, vector<512x128xf32> -> vector<512x128xf32>
    %c0_9 = arith.constant 0 : index
    %c0_10 = arith.constant 0 : index
    %6 = vector.load %arg6[%c0_9, %c0_10] : memref<32x128xbf16, #tpu.memory_space<vmem>>, vector<32x128xbf16>
    %cst_11 = arith.constant dense<0.000000e+00> : vector<512x128xf32>
    %7 = tpu.matmul %1, %6, %cst_11 {dimension_numbers = #tpu.dot_dimension_numbers<[1], [0], [0], [1], [0, 0, 1, 1], [], []>} : vector<512x32xbf16>, vector<32x128xbf16>, vector<512x128xf32> -> vector<512x128xf32>
    %8 = arith.addf %5, %7 : vector<512x128xf32>
    %c0_12 = arith.constant 0 : index
    %c0_13 = arith.constant 0 : index
    %9 = vector.load %arg7[%c0_12, %c0_13] : memref<32x128xbf16, #tpu.memory_space<vmem>>, vector<32x128xbf16>
    %cst_14 = arith.constant dense<0.000000e+00> : vector<512x128xf32>
    %10 = tpu.matmul %2, %9, %cst_14 {dimension_numbers = #tpu.dot_dimension_numbers<[1], [0], [0], [1], [0, 0, 1, 1], [], []>} : vector<512x32xbf16>, vector<32x128xbf16>, vector<512x128xf32> -> vector<512x128xf32>
    %11 = arith.addf %8, %10 : vector<512x128xf32>
    %c0_15 = arith.constant 0 : index
    %c0_16 = arith.constant 0 : index
    %12 = vector.load %arg8[%c0_15, %c0_16] : memref<1x128xf32, #tpu.memory_space<vmem>>, vector<1x128xf32>
    %13 = vector.broadcast %12 : vector<1x128xf32> to vector<512x128xf32>
    %14 = arith.addf %11, %13 : vector<512x128xf32>
    %cst_17 = arith.constant 0.000000e+00 : f32
    %15 = vector.broadcast %cst_17 : f32 to vector<512x128xf32>
    %16 = arith.cmpf ogt, %14, %15 : vector<512x128xf32>
    %cst_18 = arith.constant 1.000000e-01 : f32
    %17 = vector.broadcast %cst_18 : f32 to vector<512x128xf32>
    %18 = arith.mulf %17, %14 : vector<512x128xf32>
    %19 = arith.select %16, %14, %18 : vector<512x128xi1>, vector<512x128xf32>
    %20 = arith.truncf %19 : vector<512x128xf32> to vector<512x128xbf16>
    %c0_19 = arith.constant 0 : index
    %c0_20 = arith.constant 0 : index
    %21 = vector.load %arg9[%c0_19, %c0_20] : memref<128x128xbf16, #tpu.memory_space<vmem>>, vector<128x128xbf16>
    %cst_21 = arith.constant dense<0.000000e+00> : vector<512x128xf32>
    %22 = tpu.matmul %20, %21, %cst_21 {dimension_numbers = #tpu.dot_dimension_numbers<[1], [0], [0], [1], [0, 0, 1, 1], [], []>} : vector<512x128xbf16>, vector<128x128xbf16>, vector<512x128xf32> -> vector<512x128xf32>
    %c0_22 = arith.constant 0 : index
    %c0_23 = arith.constant 0 : index
    %23 = vector.load %arg10[%c0_22, %c0_23] : memref<1x128xf32, #tpu.memory_space<vmem>>, vector<1x128xf32>
    %24 = vector.broadcast %23 : vector<1x128xf32> to vector<512x128xf32>
    %25 = arith.addf %22, %24 : vector<512x128xf32>
    %cst_24 = arith.constant 0.000000e+00 : f32
    %26 = vector.broadcast %cst_24 : f32 to vector<512x128xf32>
    %27 = arith.cmpf ogt, %25, %26 : vector<512x128xf32>
    %cst_25 = arith.constant 1.000000e-01 : f32
    %28 = vector.broadcast %cst_25 : f32 to vector<512x128xf32>
    %29 = arith.mulf %28, %25 : vector<512x128xf32>
    %30 = arith.select %27, %25, %29 : vector<512x128xi1>, vector<512x128xf32>
    %31 = arith.truncf %30 : vector<512x128xf32> to vector<512x128xbf16>
    %c0_26 = arith.constant 0 : index
    %c0_27 = arith.constant 0 : index
    %32 = vector.load %arg11[%c0_26, %c0_27] : memref<32x128xbf16, #tpu.memory_space<vmem>>, vector<32x128xbf16>
    %cst_28 = arith.constant dense<0.000000e+00> : vector<512x128xf32>
    %33 = tpu.matmul %0, %32, %cst_28 {dimension_numbers = #tpu.dot_dimension_numbers<[1], [0], [0], [1], [0, 0, 1, 1], [], []>} : vector<512x32xbf16>, vector<32x128xbf16>, vector<512x128xf32> -> vector<512x128xf32>
    %c0_29 = arith.constant 0 : index
    %c0_30 = arith.constant 0 : index
    %34 = vector.load %arg12[%c0_29, %c0_30] : memref<32x128xbf16, #tpu.memory_space<vmem>>, vector<32x128xbf16>
    %cst_31 = arith.constant dense<0.000000e+00> : vector<512x128xf32>
    %35 = tpu.matmul %2, %34, %cst_31 {dimension_numbers = #tpu.dot_dimension_numbers<[1], [0], [0], [1], [0, 0, 1, 1], [], []>} : vector<512x32xbf16>, vector<32x128xbf16>, vector<512x128xf32> -> vector<512x128xf32>
    %36 = arith.addf %33, %35 : vector<512x128xf32>
    %c0_32 = arith.constant 0 : index
    %c0_33 = arith.constant 0 : index
    %37 = vector.load %arg13[%c0_32, %c0_33] : memref<64x128xbf16, #tpu.memory_space<vmem>>, vector<64x128xbf16>
    %cst_34 = arith.constant dense<0.000000e+00> : vector<512x128xf32>
    %38 = tpu.matmul %3, %37, %cst_34 {dimension_numbers = #tpu.dot_dimension_numbers<[1], [0], [0], [1], [0, 0, 1, 1], [], []>} : vector<512x64xbf16>, vector<64x128xbf16>, vector<512x128xf32> -> vector<512x128xf32>
    %39 = arith.addf %36, %38 : vector<512x128xf32>
    %c0_35 = arith.constant 0 : index
    %c0_36 = arith.constant 0 : index
    %40 = vector.load %arg14[%c0_35, %c0_36] : memref<128x128xbf16, #tpu.memory_space<vmem>>, vector<128x128xbf16>
    %cst_37 = arith.constant dense<0.000000e+00> : vector<512x128xf32>
    %41 = tpu.matmul %31, %40, %cst_37 {dimension_numbers = #tpu.dot_dimension_numbers<[1], [0], [0], [1], [0, 0, 1, 1], [], []>} : vector<512x128xbf16>, vector<128x128xbf16>, vector<512x128xf32> -> vector<512x128xf32>
    %42 = arith.addf %39, %41 : vector<512x128xf32>
    %c0_38 = arith.constant 0 : index
    %c0_39 = arith.constant 0 : index
    %43 = vector.load %arg15[%c0_38, %c0_39] : memref<1x128xf32, #tpu.memory_space<vmem>>, vector<1x128xf32>
    %44 = vector.broadcast %43 : vector<1x128xf32> to vector<512x128xf32>
    %45 = arith.addf %42, %44 : vector<512x128xf32>
    %c0_40 = arith.constant 0 : index
    %c0_41 = arith.constant 0 : index
    %46 = vector.load %arg16[%c0_40, %c0_41] : memref<512x128xf32, #tpu.memory_space<vmem>>, vector<512x128xf32>
    tpu.vector_store %arg16[%c0_40, %c0_41], %45 {strides = array<i32>} : memref<512x128xf32, #tpu.memory_space<vmem>>, vector<512x128xf32>,
    return
  }
  func.func @transform_0(%arg0: i32) -> (i32, i32) {
    %c0_i32 = arith.constant 0 : i32
    %c0_i32_0 = arith.constant 0 : i32
    return %arg0, %c0_i32 : i32, i32
  }
  func.func @transform_1(%arg0: i32) -> (i32, i32) {
    %c0_i32 = arith.constant 0 : i32
    %c0_i32_0 = arith.constant 0 : i32
    return %arg0, %c0_i32 : i32, i32
  }
  func.func @transform_2(%arg0: i32) -> (i32, i32) {
    %c0_i32 = arith.constant 0 : i32
    %c0_i32_0 = arith.constant 0 : i32
    return %arg0, %c0_i32 : i32, i32
  }
  func.func @transform_3(%arg0: i32) -> (i32, i32) {
    %c0_i32 = arith.constant 0 : i32
    %c0_i32_0 = arith.constant 0 : i32
    return %arg0, %c0_i32 : i32, i32
  }
  func.func @transform_4(%arg0: i32) -> (i32, i32) {
    %c0_i32 = arith.constant 0 : i32
    %c0_i32_0 = arith.constant 0 : i32
    %c0_i32_1 = arith.constant 0 : i32
    return %c0_i32, %c0_i32_0 : i32, i32
  }
  func.func @transform_5(%arg0: i32) -> (i32, i32) {
    %c0_i32 = arith.constant 0 : i32
    %c0_i32_0 = arith.constant 0 : i32
    %c0_i32_1 = arith.constant 0 : i32
    return %c0_i32, %c0_i32_0 : i32, i32
  }
  func.func @transform_6(%arg0: i32) -> (i32, i32) {
    %c0_i32 = arith.constant 0 : i32
    %c0_i32_0 = arith.constant 0 : i32
    %c0_i32_1 = arith.constant 0 : i32
    return %c0_i32, %c0_i32_0 : i32, i32
  }
  func.func @transform_7(%arg0: i32) -> (i32, i32) {
    %c0_i32 = arith.constant 0 : i32
    %c0_i32_0 = arith.constant 0 : i32
    %c0_i32_1 = arith.constant 0 : i32
    return %c0_i32, %c0_i32_0 : i32, i32
  }
  func.func @transform_8(%arg0: i32) -> (i32, i32) {
    %c0_i32 = arith.constant 0 : i32
    %c0_i32_0 = arith.constant 0 : i32
    %c0_i32_1 = arith.constant 0 : i32
    return %c0_i32, %c0_i32_0 : i32, i32
  }
  func.func @transform_9(%arg0: i32) -> (i32, i32) {
    %c0_i32 = arith.constant 0 : i32
    %c0_i32_0 = arith.constant 0 : i32
    %c0_i32_1 = arith.constant 0 : i32
    return %c0_i32, %c0_i32_0 : i32, i32
  }
  func.func @transform_10(%arg0: i32) -> (i32, i32) {
    %c0_i32 = arith.constant 0 : i32
    %c0_i32_0 = arith.constant 0 : i32
    %c0_i32_1 = arith.constant 0 : i32
    return %c0_i32, %c0_i32_0 : i32, i32
  }
  func.func @transform_11(%arg0: i32) -> (i32, i32) {
    %c0_i32 = arith.constant 0 : i32
    %c0_i32_0 = arith.constant 0 : i32
    %c0_i32_1 = arith.constant 0 : i32
    return %c0_i32, %c0_i32_0 : i32, i32
  }
  func.func @transform_12(%arg0: i32) -> (i32, i32) {
    %c0_i32 = arith.constant 0 : i32
    %c0_i32_0 = arith.constant 0 : i32
    %c0_i32_1 = arith.constant 0 : i32
    return %c0_i32, %c0_i32_0 : i32, i32
  }
  func.func @transform_13(%arg0: i32) -> (i32, i32) {
    %c0_i32 = arith.constant 0 : i32
    %c0_i32_0 = arith.constant 0 : i32
    %c0_i32_1 = arith.constant 0 : i32
    return %c0_i32, %c0_i32_0 : i32, i32
  }
  func.func @transform_14(%arg0: i32) -> (i32, i32) {
    %c0_i32 = arith.constant 0 : i32
    %c0_i32_0 = arith.constant 0 : i32
    %c0_i32_1 = arith.constant 0 : i32
    return %c0_i32, %c0_i32_0 : i32, i32
  }
  func.func @transform_15(%arg0: i32) -> (i32, i32) {
    %c0_i32 = arith.constant 0 : i32
    %c0_i32_0 = arith.constant 0 : i32
    return %arg0, %c0_i32 : i32, i32
  }
}

</mosaic_0001>

<bundles_post_ra>
// kernel: tpu_custom_call.1
= control target key start
LH: loop header
LB: loop body
LE: loop exit
PB: predicated region body
PF: predicated region fallthrough
CT: control target
= control target key end

     0   :  { %s8287_s0 = inlined_call_operand.vmem [shape: bf16[1024,32], index: 0, kind: input, shape index: {}]   ;;  %s8288_s1 = inlined_call_operand.vmem [shape: bf16[1024,32], index: 1, kind: input, shape index: {}]   ;;  %s8289_s2 = inlined_call_operand.vmem [shape: bf16[1024,32], index: 2, kind: input, shape index: {}]   ;;  %s8290_s3 = inlined_call_operand.vmem [shape: bf16[1024,64], index: 3, kind: input, shape index: {}]   ;;  %s8291_s4 = inlined_call_operand.vmem [shape: bf16[32,128], index: 4, kind: input, shape index: {}]   ;;  %s8292_s5 = inlined_call_operand.vmem [shape: bf16[32,128], index: 5, kind: input, shape index: {}]   ;;  %s8293_s6 = inlined_call_operand.vmem [shape: bf16[32,128], index: 6, kind: input, shape index: {}]   ;;  %s8294_s7 = inlined_call_operand.vmem [shape: f32[1,128], index: 7, kind: input, shape index: {}]   ;;  %s8295_s8 = inlined_call_operand.vmem [shape: bf16[128,128], index: 8, kind: input, shape index: {}]   ;;  %s8296_s9 = inlined_call_operand.vmem [shape: f32[1,128], index: 9, kind: input, shape index: {}]   ;;  %s8297_s10 = inlined_call_operand.vmem [shape: bf16[32,128], index: 10, kind: input, shape index: {}]   ;;  %s8298_s11 = inlined_call_operand.vmem [shape: bf16[32,128], index: 11, kind: input, shape index: {}]   ;;  %s8299_s12 = inlined_call_operand.vmem [shape: bf16[64,128], index: 12, kind: input, shape index: {}]   ;;  %s8300_s13 = inlined_call_operand.vmem [shape: bf16[128,128], index: 13, kind: input, shape index: {}]   ;;  %s8301_s14 = inlined_call_operand.vmem [shape: f32[1,128], index: 14, kind: input, shape index: {}]   ;;  %s8302_s15 = inlined_call_operand.hbm [shape: f32[1024,128], index: 15, kind: output, shape index: {}]  }
   0x1   :  { %8306 = sst [smem:[#allocation8_spill]] %s8287_s0 }
   0x2   :  { %20 = vsyncpa [#allocation3], 0 }
   0x3   :  { %22 = vsyncpa [#allocation3 + $0x1], 0  ;;  %s7258_s18 = smov 0   ;;  %s7260_s19 = smov 0  }
   0x4   :  { %s7262_s20 = smov 0   ;;  %s7264_s21 = smov 0  }
   0x5 LB: > { %8307 = sst [smem:[#allocation5_spill]] %s7169_s20  ;;  %s7279_s22 = sadd.s32 4294967295, %s7173_s21   ;;  %s7173_s21 = sphi %s7264_s21, %s8313_s21   ;;  %s7169_s20 = sphi %s7262_s20, %s8315_s20   ;;  %s7165_s19 = sphi %s7260_s19, %s8317_s19   ;;  %s7161_s18 = sphi %s7258_s18, %s8316_s18  }
   0x6   : > { %s5362_s23 = sadd.s32 4294967294, %s7173_s21   ;;  %s7283_s24 = sadd.s32 1, %s7173_s21  }
   0x7   : > { %8308 = sst [smem:[#allocation6_spill]] %s7283_s24  ;;  %s370_s25 = sadd.s32 1, %s7169_s20 }
   0x8   : > { %s367_s26 = ssub.s32 %s7173_s21, %s7283_s24  ;;  %p380_p0 = scmp.ne.s32.totalorder %s7169_s20, %s7165_s19 }
   0x9   : > { %p368_p1 = scmp.eq.s32.totalorder %s367_s26, 0  ;;  %p381_p2 = scmp.eq.s32.totalorder %s7279_s22, 1 }
   0xa   : > { %p386_p3 = scmp.ne.s32.totalorder %s7165_s19, %s7161_s18  ;;  %p387_p4 = scmp.eq.s32.totalorder %s5362_s23, 1 }
   0xb   : > { %s7294_s27 = scalar_select %p368_p1, %s7169_s20, %s370_s25  }
   0xc   : > { %p7296_p5 = por %p381_p2, %p380_p0  ;;  %p7300_p6 = por %p387_p4, %p386_p3 }
   0xd   : > { %8309 = sst [smem:[#allocation7_spill]] %s7294_s27  ;;  %p5365_p7 = scmp.ge.s32.totalorder %s7173_s21, 1 }
   0xe   : > { %p474_p8 = scmp.lt.s32.totalorder %s7173_s21, 3 }
  0x10   : > { %p475_p9 = pnand %p5365_p7, %p474_p8 }
  0x11   : > { %v6953_v0 = vld [vmem:[%s8292_s5] sm:$0xff] (!%p475_p9)   ;;  %s5367_s17 = sshll.u32 (!%p475_p9), %s7279_s22, 6  ;;  %v6954_v1 = vld [vmem:[%s8292_s5 + $0x8] sm:$0xff] (!%p475_p9)   ;;  %vm999_vm0 = vcmask (!%p475_p9), 261120   ;;  %s8312_s0 = sld [smem:[#allocation8_spill]] (!%p475_p9)  ;;  %vm4248_vm1 = vcmask (!%p475_p9), 523264  }
  0x12   : > { %478 = sbr.rel (%p475_p9) target bundleno = 1084 (0x43c), region = 80  ;;  %p538_p10 = scmp.lt.s32.totalorder (!%p475_p9), %s5367_s17, 127  ;;  %6020 = vmatprep.subr.bf16.mxu0 (!%p475_p9), %v6953_v0  ;;  %v6957_v2 = vld [vmem:[%s8291_s4] sm:$0xff] (!%p475_p9)   ;;  %v6974_v3 = vld [vmem:[%s8291_s4 + $0x8] sm:$0xff] (!%p475_p9)  }
  0x13   : > { %6021 = vmatpush3.bf16.msra.mxu0 (!%p475_p9), %v6953_v0  ;;  %v6991_v15 = vld [vmem:[%s8293_s6] sm:$0xff] (!%p475_p9)   ;;  %v7008_v41 = vld [vmem:[%s8293_s6 + $0x8] sm:$0xff] (!%p475_p9)   ;;  %s534_s16 = sand.u32 (!%p475_p9), 1, %s7165_s19  }
  0x14   : > { %6022 = vmatprep.subr.bf16.mxu0 (!%p475_p9), %v6954_v1  ;;  %v7037_v54 = vld [vmem:[%s8298_s11] sm:$0xff] (!%p475_p9)   ;;  %v7040_v57 = vld [vmem:[%s8298_s11 + $0x8] sm:$0xff] (!%p475_p9)   ;;  %s5366_s23 = sshll.u32 (!%p475_p9), %s534_s16, 9 }
  0x15   : > { %6304 = vmatprep.subr.bf16.mxu1 (!%p475_p9), %v7037_v54  ;;  %v7041_v58 = vld [vmem:[%s8297_s10] sm:$0xff] (!%p475_p9)  }
  0x16   : > { %6305 = vmatpush3.bf16.msra.mxu1 (!%p475_p9), %v7037_v54  ;;  %v7064_v54 = vld [vmem:[%s8295_s8 + $0x28] sm:$0xff] (!%p475_p9)  }
  0x17   : > { %6023 = vmatpush3.bf16.msra.mxu0 (!%p475_p9), %v6954_v1  ;;  %6306 = vmatprep.subr.bf16.mxu1 (!%p475_p9), %v7040_v57 }
  0x18   : > { %6088 = vmatprep.subr.bf16.mxu0 (!%p475_p9), %v6957_v2 }
  0x19   : > { %s8319_s17 = smov (!%p538_p10, %s5367_s17), 127 }
  0x1a   : > { %s7316_s20 = sshll.u32 %s8319_s17, 2  ;;  %6307 = vmatpush3.bf16.msra.mxu1 %v7040_v57  ;;  %v7066_v57 = vld [vmem:[%s8295_s8 + $0x30] sm:$0xff]   ;;  %s5733_s17 = sshll.u32 %s7279_s22, 13 }
  0x1b   : > { %s7322_s24 = scalar_lea.vmem %s8288_s1, %s7316_s20  ;;  %s7350_s26 = scalar_lea.vmem %s8312_s0, %s7316_s20  ;;  %6372 = vmatprep.subr.bf16.mxu1 %v7041_v58 }
  0x1c   : > { %v6955_v4 = vld [vmem:[%s7322_s24] sm:$0xff]   ;;  %v6956_v5 = vld [vmem:[%s7322_s24 + $0x8] sm:$0xff]   ;;  %v6958_v6 = vld [vmem:[%s7322_s24 + $0x10] sm:$0xff]   ;;  %s7407_s27 = scalar_lea.vmem %s8289_s2, %s7316_s20  ;;  %s8246_s22 = scalar_lea.sflag [#allocation3], %s534_s16 }
  0x1d   : > { %6024 = vmatprep.mubr.msk.bf16.mxu0 %vm999_vm0, %v6955_v4  ;;  %v6959_v7 = vld [vmem:[%s7322_s24 + $0x18] sm:$0xff]   ;;  %v6960_v8 = vld [vmem:[%s7322_s24 + $0x20] sm:$0xff]   ;;  %v6961_v9 = vld [vmem:[%s7322_s24 + $0x28] sm:$0xff]  }
  0x1e   : > { %6025 = vmatmul.mubr.msk.bf16.vlgmr.msra.gmra.mrb[0].mxu0 %vm999_vm0, %v6956_v5  ;;  %v6962_v10 = vld [vmem:[%s7322_s24 + $0x30] sm:$0xff]   ;;  %v6963_v11 = vld [vmem:[%s7322_s24 + $0x38] sm:$0xff]   ;;  %v6964_v12 = vld [vmem:[%s7322_s24 + $0x40] sm:$0xff]  }
  0x1f   : > { %6089 = vmatpush3.bf16.msra.mxu0 %v6957_v2  ;;  %6028 = vmatprep.mubr.msk.bf16.mxu0 %vm999_vm0, %v6958_v6  ;;  %v6965_v13 = vld [vmem:[%s7322_s24 + $0x48] sm:$0xff]   ;;  %v6966_v14 = vld [vmem:[%s7322_s24 + $0x50] sm:$0xff]   ;;  %v6967_v16 = vld [vmem:[%s7322_s24 + $0x58] sm:$0xff]  }
  0x20   : > { %6090 = vmatprep.subr.bf16.mxu0 %v6974_v3  ;;  %v6968_v17 = vld [vmem:[%s7322_s24 + $0x60] sm:$0xff]   ;;  %v6969_v18 = vld [vmem:[%s7322_s24 + $0x68] sm:$0xff]   ;;  %v6970_v19 = vld [vmem:[%s7322_s24 + $0x70] sm:$0xff]  }
  0x21   : > { %v6971_v20 = vld [vmem:[%s7322_s24 + $0x78] sm:$0xff]   ;;  %v6972_v21 = vld [vmem:[%s7322_s24 + $0x80] sm:$0xff]   ;;  %v6973_v22 = vld [vmem:[%s7322_s24 + $0x88] sm:$0xff]  }
  0x22   : > { %v6975_v23 = vld [vmem:[%s7322_s24 + $0x90] sm:$0xff]   ;;  %v6976_v24 = vld [vmem:[%s7322_s24 + $0x98] sm:$0xff]   ;;  %v6977_v25 = vld [vmem:[%s7322_s24 + $0xa0] sm:$0xff]  }
  0x23   : > { %6091 = vmatpush3.bf16.msra.mxu0 %v6974_v3  ;;  %v6978_v26 = vld [vmem:[%s7322_s24 + $0xa8] sm:$0xff]   ;;  %v6979_v27 = vld [vmem:[%s7322_s24 + $0xb0] sm:$0xff]   ;;  %v6980_v28 = vld [vmem:[%s7322_s24 + $0xb8] sm:$0xff]  }
  0x24   : > { %6156 = vmatprep.subr.bf16.mxu0 %v6991_v15  ;;  %v6981_v29 = vld [vmem:[%s7322_s24 + $0xc0] sm:$0xff]   ;;  %v6982_v30 = vld [vmem:[%s7322_s24 + $0xc8] sm:$0xff]   ;;  %v6983_v31 = vld [vmem:[%s7322_s24 + $0xd0] sm:$0xff]  }
  0x25   : > { %v6984_v32 = vld [vmem:[%s7322_s24 + $0xd8] sm:$0xff]   ;;  %v6985_v33 = vld [vmem:[%s7322_s24 + $0xe0] sm:$0xff]   ;;  %v6986_v34 = vld [vmem:[%s7322_s24 + $0xe8] sm:$0xff]  }
  0x26   : > { %6029 = vmatmul.mubr.msk.bf16.gmra.mrb[4].mxu0 %vm999_vm0, %v6959_v7  ;;  %v6987_v35 = vld [vmem:[%s7322_s24 + $0xf0] sm:$0xff]   ;;  %v6988_v36 = vld [vmem:[%s7322_s24 + $0xf8] sm:$0xff]   ;;  %v7400_v37 = vld [vmem:[%s7350_s26] sm:$0xff]   ;;  %s8107_s24 = scalar_lea.vmem [#allocation2], %s5366_s23  ;;  %s8236_s23 = scalar_lea.hbm %s8302_s15, %s5733_s17 }
  0x27   : > { %6032 = vmatprep.mubr.msk.bf16.mxu0 %vm999_vm0, %v6960_v8  ;;  %v7412_v38 = vld [vmem:[%s7407_s27] sm:$0xff]   ;;  %v7415_v39 = vld [vmem:[%s7350_s26 + $0x8] sm:$0xff]   ;;  %v7418_v40 = vld [vmem:[%s7350_s26 + $0x10] sm:$0xff]   ;;  %s5264_s30 = sshll.u32 %s8107_s24, 4  ;;  %s8238_s30 = int_to_ptr.vmem [resolvable:$true] %s5264_s30 }
  0x28   : > { %6308 = vmatprep.mubr.msk.bf16.mxu1 %vm999_vm0, %v7412_v38  ;;  %v7430_v42 = vld [vmem:[%s7350_s26 + $0x18] sm:$0xff]   ;;  %v7433_v43 = vld [vmem:[%s7350_s26 + $0x20] sm:$0xff]   ;;  %v7440_v44 = vld [vmem:[%s7350_s26 + $0x28] sm:$0xff]   ;;  %s7111_s25 = scalar_lea.vmem %s8238_s30, 8192 }
  0x29   : > { %v7443_v45 = vld [vmem:[%s7350_s26 + $0x30] sm:$0xff]   ;;  %v7450_v46 = vld [vmem:[%s7350_s26 + $0x38] sm:$0xff]   ;;  %v7453_v47 = vld [vmem:[%s7350_s26 + $0x40] sm:$0xff]   ;;  %p7112_p11 = scmp.ne.s32.totalorder %s8238_s30, %s7111_s25 }
  0x2a   : > { %v7460_v48 = vld [vmem:[%s7350_s26 + $0x48] sm:$0xff]   ;;  %v7463_v49 = vld [vmem:[%s7350_s26 + $0x50] sm:$0xff]   ;;  %v7470_v50 = vld [vmem:[%s7350_s26 + $0x58] sm:$0xff]  }
  0x2b   : > { %v7473_v51 = vld [vmem:[%s7350_s26 + $0x60] sm:$0xff]   ;;  %v7480_v52 = vld [vmem:[%s7350_s26 + $0x68] sm:$0xff]   ;;  %v7483_v53 = vld [vmem:[%s7350_s26 + $0x70] sm:$0xff]   ;;  %p7113_p12 = pnand %p7112_p11, %p7296_p5 }
  0x2c   : > { %v7493_v55 = vld [vmem:[%s7350_s26 + $0x78] sm:$0xff]   ;;  %v7496_v56 = vld [vmem:[%s7350_s26 + $0x80] sm:$0xff]   ;;  %v7509_v59 = vld [vmem:[%s7350_s26 + $0x88] sm:$0xff]  }
  0x2d   : > { %v7512_v60 = vld [vmem:[%s7407_s27 + $0x8] sm:$0xff]   ;;  %v7515_v61 = vld [vmem:[%s7350_s26 + $0x90] sm:$0xff]   ;;  %v7529_v63 = vld [vmem:[%s7350_s26 + $0x98] sm:$0xff]   ;;  %p7114_p13 = pneg %p7113_p12 }
  0x2e   : > { %6033 = vmatmul.mubr.msk.bf16.gmra.mrb[8].mxu0 %vm999_vm0, %v6961_v9  ;;  %v7518_v62 = vld [vmem:[%s7407_s27 + $0x10] sm:$0xff]   ;;  %6309 = vmatmul.mubr.msk.bf16.vlgmr.msra.gmra.mrb[0].mxu1 %vm999_vm0, %v7512_v60  ;;  %v7532_v0 = vld [vmem:[%s7407_s27 + $0x18] sm:$0xff]   ;;  %v7535_v1 = vld [vmem:[%s7350_s26 + $0xa0] sm:$0xff]  }
  0x2f   : > { %6036 = vmatprep.mubr.msk.bf16.mxu0 %vm999_vm0, %v6962_v10  ;;  %6373 = vmatpush3.bf16.msra.mxu1 %v7041_v58  ;;  %v7538_v2 = vld [vmem:[%s7407_s27 + $0x20] sm:$0xff]   ;;  %v7549_v3 = vld [vmem:[%s7350_s26 + $0xa8] sm:$0xff]   ;;  %v7555_v5 = vld [vmem:[%s7350_s26 + $0xb0] sm:$0xff]  }
  0x30   : > { %6312 = vmatprep.mubr.msk.bf16.mxu1 %vm999_vm0, %v7518_v62  ;;  %v7552_v4 = vld [vmem:[%s7407_s27 + $0x28] sm:$0xff]   ;;  %v7558_v6 = vld [vmem:[%s7407_s27 + $0x30] sm:$0xff]   ;;  %v7569_v7 = vld [vmem:[%s7350_s26 + $0xb8] sm:$0xff]  }
  0x31   : > { %v7572_v8 = vld [vmem:[%s7407_s27 + $0x38] sm:$0xff]   ;;  %v7575_v9 = vld [vmem:[%s7350_s26 + $0xc0] sm:$0xff]  }
  0x32   : > { %v7578_v10 = vld [vmem:[%s7407_s27 + $0x40] sm:$0xff]   ;;  %v7049_v58 = vld [vmem:[%s7407_s27 + $0xb8] sm:$0xff]  }
  0x36   : > { %6037 = vmatmul.mubr.msk.bf16.gmra.mrb[12].mxu0 %vm999_vm0, %v6963_v11  ;;  %6313 = vmatmul.mubr.msk.bf16.gmra.mrb[4].mxu1 %vm999_vm0, %v7532_v0  ;;  %v7051_v11 = vld [vmem:[%s8295_s8] sm:$0xff]  }
  0x37   : > { %6040 = vmatprep.mubr.msk.bf16.mxu0 %vm999_vm0, %v6964_v12  ;;  %6316 = vmatprep.mubr.msk.bf16.mxu1 %vm999_vm0, %v7538_v2  ;;  %v7592_v12 = vld [vmem:[%s7350_s26 + $0xc8] sm:$0xff]  }
  0x3e   : > { %6041 = vmatmul.mubr.msk.bf16.gmra.mrb[16].mxu0 %vm999_vm0, %v6965_v13  ;;  %6317 = vmatmul.mubr.msk.bf16.gmra.mrb[8].mxu1 %vm999_vm0, %v7552_v4  ;;  %v7595_v13 = vld [vmem:[%s7407_s27 + $0x48] sm:$0xff]  }
  0x3f   : > { %6044 = vmatprep.mubr.msk.bf16.mxu0 %vm999_vm0, %v6966_v14  ;;  %6320 = vmatprep.mubr.msk.bf16.mxu1 %vm999_vm0, %v7558_v6  ;;  %v7598_v14 = vld [vmem:[%s7350_s26 + $0xd0] sm:$0xff]  }
  0x46   : > { %6045 = vmatmul.mubr.msk.bf16.gmra.mrb[20].mxu0 %vm999_vm0, %v6967_v16  ;;  %6321 = vmatmul.mubr.msk.bf16.gmra.mrb[12].mxu1 %vm999_vm0, %v7572_v8  ;;  %v7612_v16 = vld [vmem:[%s7350_s26 + $0xd8] sm:$0xff]  }
  0x47   : > { %6048 = vmatprep.mubr.msk.bf16.mxu0 %vm999_vm0, %v6968_v17  ;;  %6324 = vmatprep.mubr.msk.bf16.mxu1 %vm999_vm0, %v7578_v10  ;;  %v7615_v17 = vld [vmem:[%s7407_s27 + $0x58] sm:$0xff]  }
  0x4e   : > { %6049 = vmatmul.mubr.msk.bf16.gmra.mrb[24].mxu0 %vm999_vm0, %v6969_v18  ;;  %6325 = vmatmul.mubr.msk.bf16.gmra.mrb[16].mxu1 %vm999_vm0, %v7595_v13  ;;  %v7618_v18 = vld [vmem:[%s7350_s26 + $0xe0] sm:$0xff]  }
  0x4f   : > { %6052 = vmatprep.mubr.msk.bf16.mxu0 %vm999_vm0, %v6970_v19  ;;  %v7621_v19 = vld [vmem:[%s7407_s27 + $0x60] sm:$0xff]  }
  0x56   : > { %6053 = vmatmul.mubr.msk.bf16.gmra.mrb[28].mxu0 %vm999_vm0, %v6971_v20  ;;  %v7632_v20 = vld [vmem:[%s7350_s26 + $0xe8] sm:$0xff]  }
  0x57   : > { %6056 = vmatprep.mubr.msk.bf16.mxu0 %vm999_vm0, %v6972_v21  ;;  %v7635_v21 = vld [vmem:[%s7407_s27 + $0x68] sm:$0xff]  }
  0x5e   : > { %6057 = vmatmul.mubr.msk.bf16.gmra.mrb[32].mxu0 %vm999_vm0, %v6973_v22  ;;  %v7638_v22 = vld [vmem:[%s7350_s26 + $0xf0] sm:$0xff]  }
  0x5f   : > { %6060 = vmatprep.mubr.msk.bf16.mxu0 %vm999_vm0, %v6975_v23  ;;  %v7641_v23 = vld [vmem:[%s7407_s27 + $0x70] sm:$0xff]  }
  0x66   : > { %6061 = vmatmul.mubr.msk.bf16.gmra.mrb[36].mxu0 %vm999_vm0, %v6976_v24  ;;  %v7652_v24 = vld [vmem:[%s7350_s26 + $0xf8] sm:$0xff]   ;;  %s7175_s26 = smov [#allocation2]  }
  0x67   : > { %6064 = vmatprep.mubr.msk.bf16.mxu0 %vm999_vm0, %v6977_v25  ;;  %v7655_v25 = vld [vmem:[%s7407_s27 + $0x78] sm:$0xff]   ;;  %s7115_s17 = sshll.u32 %s7175_s26, 4  ;;  %s7116_s17 = int_to_ptr.vmem [resolvable:$false] %s7115_s17 }
  0x68   : > { %p7118_p0 = scmp.lt.s32.totalorder %s8238_s30, %s7116_s17 }
  0x6e   : > { %6065 = vmatmul.mubr.msk.bf16.gmra.mrb[40].mxu0 %vm999_vm0, %v6978_v26  ;;  %v7658_v26 = vld [vmem:[%s7407_s27 + $0x80] sm:$0xff]  }
  0x6f   : > { %6068 = vmatprep.mubr.msk.bf16.mxu0 %vm999_vm0, %v6979_v27  ;;  %v7060_v27 = vld [vmem:[%s8297_s10 + $0x8] sm:$0xff]  }
  0x70   : > { %6374 = vmatprep.subr.bf16.mxu1 %v7060_v27 }
  0x71   : > { %6375 = vmatpush3.bf16.msra.mxu1 %v7060_v27 }
  0x76   : > { %6069 = vmatmul.mubr.msk.bf16.gmra.mrb[44].mxu0 %vm999_vm0, %v6980_v28  ;;  %v7674_v28 = vld [vmem:[%s8299_s12] sm:$0xff]  }
  0x77   : > { %6072 = vmatprep.mubr.msk.bf16.mxu0 %vm999_vm0, %v6981_v29  ;;  %v7677_v29 = vld [vmem:[%s7407_s27 + $0x88] sm:$0xff]   ;;  %6440 = vmatprep.subr.bf16.mxu1 %v7674_v28 }
  0x7e   : > { %6073 = vmatmul.mubr.msk.bf16.gmra.mrb[48].mxu0 %vm999_vm0, %v6982_v30  ;;  %v7681_v30 = vld [vmem:[%s7407_s27 + $0x90] sm:$0xff]  }
  0x7f   : > { %6076 = vmatprep.mubr.msk.bf16.mxu0 %vm999_vm0, %v6983_v31  ;;  %v7056_v31 = vld [vmem:[%s8295_s8 + $0x8] sm:$0xff]  }
  0x86   : > { %6077 = vmatmul.mubr.msk.bf16.gmra.mrb[52].mxu0 %vm999_vm0, %v6984_v32  ;;  %v7061_v32 = vld [vmem:[%s8295_s8 + $0x10] sm:$0xff]  }
  0x87   : > { %6080 = vmatprep.mubr.msk.bf16.mxu0 %vm999_vm0, %v6985_v33  ;;  %v7698_v33 = vld [vmem:[%s7407_s27 + $0x98] sm:$0xff]  }
  0x8e   : > { %6081 = vmatmul.mubr.msk.bf16.gmra.mrb[56].mxu0 %vm999_vm0, %v6986_v34  ;;  %v7701_v34 = vld [vmem:[%s7407_s27 + $0xa0] sm:$0xff]  }
  0x8f   : > { %6084 = vmatprep.mubr.msk.bf16.mxu0 %vm999_vm0, %v6987_v35  ;;  %v7062_v35 = vld [vmem:[%s8295_s8 + $0x18] sm:$0xff]  }
  0x96   : > { %6085 = vmatmul.mubr.msk.bf16.gmra.mrb[60].mxu0 %vm999_vm0, %v6988_v36  ;;  %v7063_v36 = vld [vmem:[%s8295_s8 + $0x20] sm:$0xff]  }
  0x97   : > { %6092 = vmatprep.mubr.msk.bf16.mxu0 %vm999_vm0, %v7400_v37 }
  0x9e   : > { %6093 = vmatmul.mubr.msk.bf16.vlgmr.msra.gmra.mrb[0].mxu0 %vm999_vm0, %v7415_v39 }
  0x9f   : > { %6157 = vmatpush3.bf16.msra.mxu0 %v6991_v15  ;;  %6096 = vmatprep.mubr.msk.bf16.mxu0 %vm999_vm0, %v7418_v40  ;;  %v7601_v15 = vld [vmem:[%s7407_s27 + $0x50] sm:$0xff]  }
  0xa0   : > { %6158 = vmatprep.subr.bf16.mxu0 %v7008_v41  ;;  %6328 = vmatprep.mubr.msk.bf16.mxu1 %vm999_vm0, %v7601_v15 }
  0xa1   : > { %6329 = vmatmul.mubr.msk.bf16.gmra.mrb[20].mxu1 %vm999_vm0, %v7615_v17 }
  0xa2   : > { %6332 = vmatprep.mubr.msk.bf16.mxu1 %vm999_vm0, %v7621_v19 }
  0xa3   : > { %6159 = vmatpush3.bf16.msra.mxu0 %v7008_v41  ;;  %v7048_v41 = vld [vmem:[%s7407_s27 + $0xb0] sm:$0xff]  }
  0xa4   : > { %6224 = vmatprep.subr.bf16.mxu0 %v7051_v11 }
  0xa6   : > { %6097 = vmatmul.mubr.msk.bf16.gmra.mrb[4].mxu0 %vm999_vm0, %v7430_v42 }
  0xa7   : > { %6100 = vmatprep.mubr.msk.bf16.mxu0 %vm999_vm0, %v7433_v43 }
  0xa9   : > { %6333 = vmatmul.mubr.msk.bf16.gmra.mrb[24].mxu1 %vm999_vm0, %v7635_v21 }
  0xaa   : > { %6336 = vmatprep.mubr.msk.bf16.mxu1 %vm999_vm0, %v7641_v23 }
  0xae   : > { %6101 = vmatmul.mubr.msk.bf16.gmra.mrb[8].mxu0 %vm999_vm0, %v7440_v44 }
  0xaf   : > { %6104 = vmatprep.mubr.msk.bf16.mxu0 %vm999_vm0, %v7443_v45 }
  0xb1   : > { %6337 = vmatmul.mubr.msk.bf16.gmra.mrb[28].mxu1 %vm999_vm0, %v7655_v25 }
  0xb2   : > { %6340 = vmatprep.mubr.msk.bf16.mxu1 %vm999_vm0, %v7658_v26 }
  0xb6   : > { %6105 = vmatmul.mubr.msk.bf16.gmra.mrb[12].mxu0 %vm999_vm0, %v7450_v46 }
  0xb7   : > { %6108 = vmatprep.mubr.msk.bf16.mxu0 %vm999_vm0, %v7453_v47 }
  0xb9   : > { %6341 = vmatmul.mubr.msk.bf16.gmra.mrb[32].mxu1 %vm999_vm0, %v7677_v29 }
  0xba   : > { %6344 = vmatprep.mubr.msk.bf16.mxu1 %vm999_vm0, %v7681_v30 }
  0xbe   : > { %6109 = vmatmul.mubr.msk.bf16.gmra.mrb[16].mxu0 %vm999_vm0, %v7460_v48 }
  0xbf   : > { %6112 = vmatprep.mubr.msk.bf16.mxu0 %vm999_vm0, %v7463_v49 }
  0xc1   : > { %6345 = vmatmul.mubr.msk.bf16.gmra.mrb[36].mxu1 %vm999_vm0, %v7698_v33 }
  0xc2   : > { %6348 = vmatprep.mubr.msk.bf16.mxu1 %vm999_vm0, %v7701_v34 }
  0xc6   : > { %6113 = vmatmul.mubr.msk.bf16.gmra.mrb[20].mxu0 %vm999_vm0, %v7470_v50 }
  0xc7   : > { %6116 = vmatprep.mubr.msk.bf16.mxu0 %vm999_vm0, %v7473_v51 }
  0xce   : > { %6117 = vmatmul.mubr.msk.bf16.gmra.mrb[24].mxu0 %vm999_vm0, %v7480_v52 }
  0xcf   : > { %6120 = vmatprep.mubr.msk.bf16.mxu0 %vm999_vm0, %v7483_v53 }
  0xd6   : > { %6121 = vmatmul.mubr.msk.bf16.gmra.mrb[28].mxu0 %vm999_vm0, %v7493_v55 }
  0xd7   : > { %6124 = vmatprep.mubr.msk.bf16.mxu0 %vm999_vm0, %v7496_v56 }
  0xde   : > { %6125 = vmatmul.mubr.msk.bf16.gmra.mrb[32].mxu0 %vm999_vm0, %v7509_v59 }
  0xdf   : > { %6128 = vmatprep.mubr.msk.bf16.mxu0 %vm999_vm0, %v7515_v61 }
  0xe6   : > { %6129 = vmatmul.mubr.msk.bf16.gmra.mrb[36].mxu0 %vm999_vm0, %v7529_v63 }
  0xe7   : > { %6132 = vmatprep.mubr.msk.bf16.mxu0 %vm999_vm0, %v7535_v1 }
  0xee   : > { %6133 = vmatmul.mubr.msk.bf16.gmra.mrb[40].mxu0 %vm999_vm0, %v7549_v3 }
  0xef   : > { %6136 = vmatprep.mubr.msk.bf16.mxu0 %vm999_vm0, %v7555_v5 }
  0xf6   : > { %6137 = vmatmul.mubr.msk.bf16.gmra.mrb[44].mxu0 %vm999_vm0, %v7569_v7 }
  0xf7   : > { %6140 = vmatprep.mubr.msk.bf16.mxu0 %vm999_vm0, %v7575_v9 }
  0xfe   : > { %6141 = vmatmul.mubr.msk.bf16.gmra.mrb[48].mxu0 %vm999_vm0, %v7592_v12 }
  0xff   : > { %6144 = vmatprep.mubr.msk.bf16.mxu0 %vm999_vm0, %v7598_v14 }
 0x106   : > { %6145 = vmatmul.mubr.msk.bf16.gmra.mrb[52].mxu0 %vm999_vm0, %v7612_v16 }
 0x107   : > { %6148 = vmatprep.mubr.msk.bf16.mxu0 %vm999_vm0, %v7618_v18 }
 0x10e   : > { %6149 = vmatmul.mubr.msk.bf16.gmra.mrb[56].mxu0 %vm999_vm0, %v7632_v20 }
 0x10f   : > { %6152 = vmatprep.mubr.msk.bf16.mxu0 %vm999_vm0, %v7638_v22 }
 0x116   : > { %6153 = vmatmul.mubr.msk.bf16.gmra.mrb[60].mxu0 %vm999_vm0, %v7652_v24 }
 0x117   : > { %6160 = vmatprep.mubr.msk.bf16.mxu0 %vm999_vm0, %v7412_v38  ;;  %v7047_v38 = vld [vmem:[%s7407_s27 + $0xa8] sm:$0xff]  }
 0x118   : > { %6349 = vmatmul.mubr.msk.bf16.gmra.mrb[40].mxu1 %vm999_vm0, %v7047_v38 }
 0x119   : > { %6352 = vmatprep.mubr.msk.bf16.mxu1 %vm999_vm0, %v7048_v41 }
 0x11e   : > { %6161 = vmatmul.mubr.msk.bf16.vlgmr.msra.gmra.mrb[0].mxu0 %vm999_vm0, %v7512_v60  ;;  %v7050_v60 = vld [vmem:[%s7407_s27 + $0xc0] sm:$0xff]  }
 0x11f   : > { %6164 = vmatprep.mubr.msk.bf16.mxu0 %vm999_vm0, %v7518_v62  ;;  %6225 = vmatpush3.bf16.msra.mxu0 %v7051_v11  ;;  %v7067_v62 = vld [vmem:[%s8295_s8 + $0x38] sm:$0xff]  }
 0x120   : > { %6226 = vmatprep.subr.bf16.mxu0 %v7056_v31  ;;  %6353 = vmatmul.mubr.msk.bf16.gmra.mrb[44].mxu1 %vm999_vm0, %v7049_v58  ;;  %v7059_v11 = vld [vmem:[%s7407_s27 + $0xf8] sm:$0xff]  }
 0x121   : > { %6356 = vmatprep.mubr.msk.bf16.mxu1 %vm999_vm0, %v7050_v60 }
 0x123   : > { %6227 = vmatpush3.bf16.msra.mxu0 %v7056_v31 }
 0x124   : > { %6228 = vmatprep.subr.bf16.mxu0 %v7061_v32 }
 0x126   : > { %6165 = vmatmul.mubr.msk.bf16.gmra.mrb[4].mxu0 %vm999_vm0, %v7532_v0  ;;  %v7052_v0 = vld [vmem:[%s7407_s27 + $0xc8] sm:$0xff]  }
 0x127   : > { %6168 = vmatprep.mubr.msk.bf16.mxu0 %vm999_vm0, %v7538_v2  ;;  %6229 = vmatpush3.bf16.msra.mxu0 %v7061_v32  ;;  %v7053_v2 = vld [vmem:[%s7407_s27 + $0xd0] sm:$0xff]  }
 0x128   : > { %6230 = vmatprep.subr.bf16.mxu0 %v7062_v35  ;;  %6357 = vmatmul.mubr.msk.bf16.gmra.mrb[48].mxu1 %vm999_vm0, %v7052_v0 }
 0x129   : > { %6360 = vmatprep.mubr.msk.bf16.mxu1 %vm999_vm0, %v7053_v2 }
 0x12b   : > { %6231 = vmatpush3.bf16.msra.mxu0 %v7062_v35 }
 0x12c   : > { %6232 = vmatprep.subr.bf16.mxu0 %v7063_v36 }
 0x12e   : > { %6169 = vmatmul.mubr.msk.bf16.gmra.mrb[8].mxu0 %vm999_vm0, %v7552_v4  ;;  %v7054_v4 = vld [vmem:[%s7407_s27 + $0xd8] sm:$0xff]  }
 0x12f   : > { %6172 = vmatprep.mubr.msk.bf16.mxu0 %vm999_vm0, %v7558_v6  ;;  %6233 = vmatpush3.bf16.msra.mxu0 %v7063_v36  ;;  %v7055_v6 = vld [vmem:[%s7407_s27 + $0xe0] sm:$0xff]  }
 0x130   : > { %6234 = vmatprep.subr.bf16.mxu0 %v7064_v54  ;;  %6361 = vmatmul.mubr.msk.bf16.gmra.mrb[52].mxu1 %vm999_vm0, %v7054_v4 }
 0x131   : > { %6364 = vmatprep.mubr.msk.bf16.mxu1 %vm999_vm0, %v7055_v6 }
 0x133   : > { %6235 = vmatpush3.bf16.msra.mxu0 %v7064_v54 }
 0x134   : > { %6236 = vmatprep.subr.bf16.mxu0 %v7066_v57 }
 0x136   : > { %6173 = vmatmul.mubr.msk.bf16.gmra.mrb[12].mxu0 %vm999_vm0, %v7572_v8  ;;  %v7057_v8 = vld [vmem:[%s7407_s27 + $0xe8] sm:$0xff]  }
 0x137   : > { %6176 = vmatprep.mubr.msk.bf16.mxu0 %vm999_vm0, %v7578_v10  ;;  %6237 = vmatpush3.bf16.msra.mxu0 %v7066_v57  ;;  %v7058_v10 = vld [vmem:[%s7407_s27 + $0xf0] sm:$0xff]   ;;  %s7869_s27 = scalar_lea.vmem %s8290_s3, %s7316_s20 }
 0x138   : > { %6238 = vmatprep.subr.bf16.mxu0 %v7067_v62  ;;  %6365 = vmatmul.mubr.msk.bf16.gmra.mrb[56].mxu1 %vm999_vm0, %v7057_v8  ;;  %v7085_v57 = vld [vmem:[%s7869_s27 + $0x58] sm:$0xff]  }
 0x139   : > { %6368 = vmatprep.mubr.msk.bf16.mxu1 %vm999_vm0, %v7058_v10 }
 0x13b   : > { %6239 = vmatpush3.bf16.msra.mxu0 %v7067_v62 }
 0x13e   : > { %6177 = vmatmul.mubr.msk.bf16.gmra.mrb[16].mxu0 %vm999_vm0, %v7595_v13 }
 0x13f   : > { %6180 = vmatprep.mubr.msk.bf16.mxu0 %vm999_vm0, %v7601_v15  ;;  %v7088_v15 = vld [vmem:[%s8300_s13 + $0x18] sm:$0xff]  }
 0x140   : > { %6369 = vmatmul.mubr.msk.bf16.gmra.mrb[60].mxu1 %vm999_vm0, %v7059_v11 }
 0x141   : > { %6376 = vmatprep.mubr.msk.bf16.mxu1 %vm999_vm0, %v7400_v37  ;;  %v7068_v37 = vld [vmem:[%s8299_s12 + $0x8] sm:$0xff]  }
 0x146   : > { %6181 = vmatmul.mubr.msk.bf16.gmra.mrb[20].mxu0 %vm999_vm0, %v7615_v17 }
 0x147   : > { %6184 = vmatprep.mubr.msk.bf16.mxu0 %vm999_vm0, %v7621_v19 }
 0x148   : > { %6377 = vmatmul.mubr.msk.bf16.vlgmr.msra.gmra.mrb[0].mxu1 %vm999_vm0, %v7415_v39  ;;  %v7069_v39 = vld [vmem:[%s8299_s12 + $0x10] sm:$0xff]  }
 0x149   : > { %6441 = vmatpush3.bf16.msra.mxu1 %v7674_v28  ;;  %6380 = vmatprep.mubr.msk.bf16.mxu1 %vm999_vm0, %v7418_v40  ;;  %v7070_v40 = vld [vmem:[%s8299_s12 + $0x18] sm:$0xff]  }
 0x14a   : > { %6442 = vmatprep.subr.bf16.mxu1 %v7068_v37 }
 0x14d   : > { %6443 = vmatpush3.bf16.msra.mxu1 %v7068_v37  ;;  %v7103_v37 = vld [vmem:[%s8300_s13 + $0x30] sm:$0xff]  }
 0x14e   : > { %6185 = vmatmul.mubr.msk.bf16.gmra.mrb[24].mxu0 %vm999_vm0, %v7635_v21  ;;  %6444 = vmatprep.subr.bf16.mxu1 %v7069_v39 }
 0x14f   : > { %6188 = vmatprep.mubr.msk.bf16.mxu0 %vm999_vm0, %v7641_v23  ;;  %v7084_v23 = vld [vmem:[%s7869_s27 + $0x50] sm:$0xff]  }
 0x150   : > { %6381 = vmatmul.mubr.msk.bf16.gmra.mrb[4].mxu1 %vm999_vm0, %v7430_v42  ;;  %v7071_v42 = vld [vmem:[%s7869_s27] sm:$0xff]  }
 0x151   : > { %6384 = vmatprep.mubr.msk.bf16.mxu1 %vm999_vm0, %v7433_v43  ;;  %6445 = vmatpush3.bf16.msra.mxu1 %v7069_v39  ;;  %v7072_v43 = vld [vmem:[%s7869_s27 + $0x8] sm:$0xff]  }
 0x152   : > { %6446 = vmatprep.subr.bf16.mxu1 %v7070_v40 }
 0x155   : > { %6447 = vmatpush3.bf16.msra.mxu1 %v7070_v40 }
 0x156   : > { %6189 = vmatmul.mubr.msk.bf16.gmra.mrb[28].mxu0 %vm999_vm0, %v7655_v25 }
 0x157   : > { %6192 = vmatprep.mubr.msk.bf16.mxu0 %vm999_vm0, %v7658_v26 }
 0x158   : > { %6385 = vmatmul.mubr.msk.bf16.gmra.mrb[8].mxu1 %vm999_vm0, %v7440_v44  ;;  %v7073_v44 = vld [vmem:[%s8300_s13] sm:$0xff]  }
 0x159   : > { %6388 = vmatprep.mubr.msk.bf16.mxu1 %vm999_vm0, %v7443_v45  ;;  %6512 = vmatprep.subr.bf16.mxu1 %v7073_v44  ;;  %v7074_v45 = vld [vmem:[%s7869_s27 + $0x10] sm:$0xff]  }
 0x15e   : > { %6193 = vmatmul.mubr.msk.bf16.gmra.mrb[32].mxu0 %vm999_vm0, %v7677_v29  ;;  %v7093_v29 = vld [vmem:[%s8300_s13 + $0x20] sm:$0xff]  }
 0x15f   : > { %6196 = vmatprep.mubr.msk.bf16.mxu0 %vm999_vm0, %v7681_v30 }
 0x160   : > { %6389 = vmatmul.mubr.msk.bf16.gmra.mrb[12].mxu1 %vm999_vm0, %v7450_v46  ;;  %v7075_v46 = vld [vmem:[%s7869_s27 + $0x18] sm:$0xff]  }
 0x161   : > { %6392 = vmatprep.mubr.msk.bf16.mxu1 %vm999_vm0, %v7453_v47  ;;  %v7076_v47 = vld [vmem:[%s7869_s27 + $0x20] sm:$0xff]  }
 0x166   : > { %6197 = vmatmul.mubr.msk.bf16.gmra.mrb[36].mxu0 %vm999_vm0, %v7698_v33 }
 0x167   : > { %6200 = vmatprep.mubr.msk.bf16.mxu0 %vm999_vm0, %v7701_v34 }
 0x168   : > { %6393 = vmatmul.mubr.msk.bf16.gmra.mrb[16].mxu1 %vm999_vm0, %v7460_v48  ;;  %v7077_v48 = vld [vmem:[%s7869_s27 + $0x28] sm:$0xff]  }
 0x169   : > { %6396 = vmatprep.mubr.msk.bf16.mxu1 %vm999_vm0, %v7463_v49  ;;  %v7889_v49 = vld [vmem:[%s8294_s7] ss:$0 sm:$0xff] }
 0x16e   : > { %6201 = vmatmul.mubr.msk.bf16.gmra.mrb[40].mxu0 %vm999_vm0, %v7047_v38  ;;  %v7098_v38 = vld [vmem:[%s8300_s13 + $0x28] sm:$0xff]  }
 0x16f   : > { %6204 = vmatprep.mubr.msk.bf16.mxu0 %vm999_vm0, %v7048_v41 }
 0x170   : > { %6397 = vmatmul.mubr.msk.bf16.gmra.mrb[20].mxu1 %vm999_vm0, %v7470_v50  ;;  %v7078_v50 = vld [vmem:[%s8300_s13 + $0x8] sm:$0xff]  }
 0x171   : > { %6400 = vmatprep.mubr.msk.bf16.mxu1 %vm999_vm0, %v7473_v51  ;;  %v7079_v51 = vld [vmem:[%s7869_s27 + $0x30] sm:$0xff]  }
 0x176   : > { %6205 = vmatmul.mubr.msk.bf16.gmra.mrb[44].mxu0 %vm999_vm0, %v7049_v58 }
 0x177   : > { %6208 = vmatprep.mubr.msk.bf16.mxu0 %vm999_vm0, %v7050_v60 }
 0x178   : > { %6401 = vmatmul.mubr.msk.bf16.gmra.mrb[24].mxu1 %vm999_vm0, %v7480_v52 }
 0x179   : > { %6404 = vmatprep.mubr.msk.bf16.mxu1 %vm999_vm0, %v7483_v53 }
 0x17e   : > { %6209 = vmatmul.mubr.msk.bf16.gmra.mrb[48].mxu0 %vm999_vm0, %v7052_v0 }
 0x17f   : > { %6212 = vmatprep.mubr.msk.bf16.mxu0 %vm999_vm0, %v7053_v2  ;;  %v7086_v2 = vld [vmem:[%s7869_s27 + $0x60] sm:$0xff]  }
 0x180   : > { %6405 = vmatmul.mubr.msk.bf16.gmra.mrb[28].mxu1 %vm999_vm0, %v7493_v55 }
 0x181   : > { %6408 = vmatprep.mubr.msk.bf16.mxu1 %vm999_vm0, %v7496_v56  ;;  %v7080_v56 = vld [vmem:[%s7869_s27 + $0x38] sm:$0xff]  }
 0x186   : > { %6213 = vmatmul.mubr.msk.bf16.gmra.mrb[52].mxu0 %vm999_vm0, %v7054_v4 }
 0x187   : > { %6216 = vmatprep.mubr.msk.bf16.mxu0 %vm999_vm0, %v7055_v6 }
 0x188   : > { %6409 = vmatmul.mubr.msk.bf16.gmra.mrb[32].mxu1 %vm999_vm0, %v7509_v59 }
 0x189   : > { %6412 = vmatprep.mubr.msk.bf16.mxu1 %vm999_vm0, %v7515_v61 }
 0x18e   : > { %6217 = vmatmul.mubr.msk.bf16.gmra.mrb[56].mxu0 %vm999_vm0, %v7057_v8 }
 0x18f   : > { %6220 = vmatprep.mubr.msk.bf16.mxu0 %vm999_vm0, %v7058_v10 }
 0x190   : > { %6413 = vmatmul.mubr.msk.bf16.gmra.mrb[36].mxu1 %vm999_vm0, %v7529_v63 }
 0x191   : > { %6416 = vmatprep.mubr.msk.bf16.mxu1 %vm999_vm0, %v7535_v1 }
 0x196   : > { %6221 = vmatmul.mubr.msk.bf16.gmra.mrb[60].mxu0 %vm999_vm0, %v7059_v11 }
 0x198   : > { %6417 = vmatmul.mubr.msk.bf16.gmra.mrb[40].mxu1 %vm999_vm0, %v7549_v3 }
 0x199   : > { %6420 = vmatprep.mubr.msk.bf16.mxu1 %vm999_vm0, %v7555_v5 }
 0x1a0   : > { %6421 = vmatmul.mubr.msk.bf16.gmra.mrb[44].mxu1 %vm999_vm0, %v7569_v7 }
 0x1a1   : > { %6424 = vmatprep.mubr.msk.bf16.mxu1 %vm999_vm0, %v7575_v9  ;;  %v7081_v9 = vld [vmem:[%s7869_s27 + $0x40] sm:$0xff]  }
 0x1a8   : > { %6425 = vmatmul.mubr.msk.bf16.gmra.mrb[48].mxu1 %vm999_vm0, %v7592_v12  ;;  %v7083_v12 = vld [vmem:[%s8300_s13 + $0x10] sm:$0xff]  }
 0x1a9   : > { %6428 = vmatprep.mubr.msk.bf16.mxu1 %vm999_vm0, %v7598_v14 }
 0x1b0   : > { %6429 = vmatmul.mubr.msk.bf16.gmra.mrb[52].mxu1 %vm999_vm0, %v7612_v16 }
 0x1b1   : > { %6432 = vmatprep.mubr.msk.bf16.mxu1 %vm999_vm0, %v7618_v18  ;;  %v7082_v18 = vld [vmem:[%s7869_s27 + $0x48] sm:$0xff]  }
 0x1b8   : > { %6433 = vmatmul.mubr.msk.bf16.gmra.mrb[56].mxu1 %vm999_vm0, %v7632_v20 }
 0x1b9   : > { %6436 = vmatprep.mubr.msk.bf16.mxu1 %vm999_vm0, %v7638_v22 }
 0x1c0   : > { %6437 = vmatmul.mubr.msk.bf16.gmra.mrb[60].mxu1 %vm999_vm0, %v7652_v24 }
 0x1c1   : > { %6448 = vmatprep.mubr.msk.bf16.mxu1 %vm4248_vm1, %v7071_v42 }
 0x1c8   : > { %6449 = vmatmul.mubr.msk.bf16.vlgmr.msra.gmra.mrb[0].mxu1 %vm4248_vm1, %v7072_v43 }
 0x1c9   : > { %6513 = vmatpush3.bf16.msra.mxu1 %v7073_v44  ;;  %6452 = vmatprep.mubr.msk.bf16.mxu1 %vm4248_vm1, %v7074_v45 }
 0x1ca   : > { %6514 = vmatprep.subr.bf16.mxu1 %v7078_v50 }
 0x1cd   : > { %6515 = vmatpush3.bf16.msra.mxu1 %v7078_v50 }
 0x1ce   : > { %6516 = vmatprep.subr.bf16.mxu1 %v7083_v12 }
 0x1d0   : > { %6453 = vmatmul.mubr.msk.bf16.gmra.mrb[4].mxu1 %vm4248_vm1, %v7075_v46 }
 0x1d1   : > { %6456 = vmatprep.mubr.msk.bf16.mxu1 %vm4248_vm1, %v7076_v47  ;;  %6517 = vmatpush3.bf16.msra.mxu1 %v7083_v12  ;;  %v7108_v47 = vld [vmem:[%s8300_s13 + $0x38] sm:$0xff]  }
 0x1d2   : > { %6518 = vmatprep.subr.bf16.mxu1 %v7088_v15 }
 0x1d5   : > { %6519 = vmatpush3.bf16.msra.mxu1 %v7088_v15 }
 0x1d6   : > { %6520 = vmatprep.subr.bf16.mxu1 %v7093_v29 }
 0x1d8   : > { %6457 = vmatmul.mubr.msk.bf16.gmra.mrb[8].mxu1 %vm4248_vm1, %v7077_v48 }
 0x1d9   : > { %6460 = vmatprep.mubr.msk.bf16.mxu1 %vm4248_vm1, %v7079_v51  ;;  %6521 = vmatpush3.bf16.msra.mxu1 %v7093_v29  ;;  %v7087_v51 = vld [vmem:[%s7869_s27 + $0x68] sm:$0xff]  }
 0x1da   : > { %6522 = vmatprep.subr.bf16.mxu1 %v7098_v38 }
 0x1dd   : > { %6523 = vmatpush3.bf16.msra.mxu1 %v7098_v38 }
 0x1de   : > { %6524 = vmatprep.subr.bf16.mxu1 %v7103_v37 }
 0x1e0   : > { %6461 = vmatmul.mubr.msk.bf16.gmra.mrb[12].mxu1 %vm4248_vm1, %v7080_v56 }
 0x1e1   : > { %6464 = vmatprep.mubr.msk.bf16.mxu1 %vm4248_vm1, %v7081_v9  ;;  %6525 = vmatpush3.bf16.msra.mxu1 %v7103_v37 }
 0x1e2   : > { %6526 = vmatprep.subr.bf16.mxu1 %v7108_v47 }
 0x1e5   : > { %6527 = vmatpush3.bf16.msra.mxu1 %v7108_v47  ;;  %v7095_v47 = vld [vmem:[%s7869_s27 + $0x98] sm:$0xff]  }
 0x1e8   : > { %6465 = vmatmul.mubr.msk.bf16.gmra.mrb[16].mxu1 %vm4248_vm1, %v7082_v18 }
 0x1e9   : > { %6468 = vmatprep.mubr.msk.bf16.mxu1 %vm4248_vm1, %v7084_v23 }
 0x1f0   : > { %6469 = vmatmul.mubr.msk.bf16.gmra.mrb[20].mxu1 %vm4248_vm1, %v7085_v57 }
 0x1f1   : > { %v6162_v52 = vpop.f32.mrb[0].mxu0  ;;  %6472 = vmatprep.mubr.msk.bf16.mxu1 %vm4248_vm1, %v7086_v2 }
 0x1f2   : > { %v2576_v53 = vadd.f32 %v6162_v52, %v7889_v49  ;;  %v2248_v55 = vpop.f32.mrb[1].mxu0 }
 0x1f3   : > { %v2574_v59 = vadd.f32 %v7889_v49, %v2248_v55  ;;  %v6163_v61 = vpop.f32.mrb[2].mxu0 }
 0x1f4   : > { %v2704_v63 = vmul.f32 0.1, %v2576_v53  ;;  %v2577_v1 = vadd.f32 %v6163_v61, %v7889_v49  ;;  %v2251_v3 = vpop.f32.mrb[3].mxu0  ;;  %vm2640_vm2 = vcmp.gt.f32.partialorder %v2576_v53, 0.0 }
 0x1f5   : > { %v2702_v5 = vmul.f32 0.1, %v2574_v59  ;;  %v2575_v7 = vadd.f32 %v7889_v49, %v2251_v3  ;;  %vm2638_vm3 = vcmp.gt.f32.partialorder %v2574_v59, 0.0 }
 0x1f6   : > { %vm2641_vm4 = vcmp.gt.f32.partialorder %v2577_v1, 0.0  ;;  %v2705_v13 = vmul.f32 0.1, %v2577_v1  ;;  %v2768_v16 = vsel %vm2640_vm2, %v2576_v53, %v2704_v63 }
 0x1f7   : > { %vm2639_vm5 = vcmp.gt.f32.partialorder %v2575_v7, 0.0  ;;  %v2703_v14 = vmul.f32 0.1, %v2575_v7  ;;  %v2766_v21 = vsel %vm2638_vm3, %v2574_v59, %v2702_v5  ;;  %v7089_v59 = vld [vmem:[%s7869_s27 + $0x70] sm:$0xff]  }
 0x1f8   : > { %v2769_v17 = vsel %vm2641_vm4, %v2577_v1, %v2705_v13  ;;  %6473 = vmatmul.mubr.msk.bf16.gmra.mrb[24].mxu1 %vm4248_vm1, %v7087_v51 }
 0x1f9   : > { %v2831_v19 = vpack.c.bf16 %v2769_v17, %v2768_v16  ;;  %v6166_v20 = vpop.f32.mrb[4].mxu0  ;;  %v2767_v22 = vsel %vm2639_vm5, %v2575_v7, %v2703_v14  ;;  %6476 = vmatprep.mubr.msk.bf16.mxu1 %vm4248_vm1, %v7089_v59 }
 0x1fa   : > { %v2580_v24 = vadd.f32 %v6166_v20, %v7889_v49  ;;  %v2264_v25 = vpop.f32.mrb[5].mxu0  ;;  %v2830_v26 = vpack.c.bf16 %v2767_v22, %v2766_v21 }
 0x1fb   : > { %v2578_v27 = vadd.f32 %v7889_v49, %v2264_v25  ;;  %v6167_v28 = vpop.f32.mrb[6].mxu0 }
 0x1fc   : > { %v2708_v30 = vmul.f32 0.1, %v2580_v24  ;;  %v2581_v31 = vadd.f32 %v6167_v28, %v7889_v49  ;;  %v2267_v32 = vpop.f32.mrb[7].mxu0  ;;  %6240 = vmatprep.mubr.bf16.mxu0 %v2830_v26  ;;  %vm2644_vm6 = vcmp.gt.f32.partialorder %v2580_v24, 0.0 }
 0x1fd   : > { %v2706_v33 = vmul.f32 0.1, %v2578_v27  ;;  %v2579_v34 = vadd.f32 %v7889_v49, %v2267_v32  ;;  %6241 = vmatmul.mubr.bf16.vlgmr.msra.gmra.mrb[64].mxu0 %v2831_v19  ;;  %vm2642_vm7 = vcmp.gt.f32.partialorder %v2578_v27, 0.0  ;;  %v7090_v19 = vld [vmem:[%s7869_s27 + $0x78] sm:$0xff]  }
 0x1fe   : > { %vm2645_vm8 = vcmp.gt.f32.partialorder %v2581_v31, 0.0  ;;  %v2709_v35 = vmul.f32 0.1, %v2581_v31  ;;  %v2772_v41 = vsel %vm2644_vm6, %v2580_v24, %v2708_v30  ;;  %v7091_v24 = vld [vmem:[%s7869_s27 + $0x80] sm:$0xff]  }
 0x1ff   : > { %vm2643_vm9 = vcmp.gt.f32.partialorder %v2579_v34, 0.0  ;;  %v2707_v36 = vmul.f32 0.1, %v2579_v34  ;;  %v2770_v60 = vsel %vm2642_vm7, %v2578_v27, %v2706_v33 }
 0x200   : > { %v2773_v54 = vsel %vm2645_vm8, %v2581_v31, %v2709_v35  ;;  %6477 = vmatmul.mubr.msk.bf16.gmra.mrb[28].mxu1 %vm4248_vm1, %v7090_v19 }
 0x201   : > { %v6170_v58 = vpop.f32.mrb[8].mxu0  ;;  %v2771_v62 = vsel %vm2643_vm9, %v2579_v34, %v2707_v36  ;;  %v2833_v0 = vpack.c.bf16 %v2773_v54, %v2772_v41  ;;  %6480 = vmatprep.mubr.msk.bf16.mxu1 %vm4248_vm1, %v7091_v24  ;;  %v7092_v54 = vld [vmem:[%s7869_s27 + $0x88] sm:$0xff]  }
 0x202   : > { %v2584_v4 = vadd.f32 %v6170_v58, %v7889_v49  ;;  %v2280_v6 = vpop.f32.mrb[9].mxu0  ;;  %v2832_v8 = vpack.c.bf16 %v2771_v62, %v2770_v60 }
 0x203   : > { %v2582_v10 = vadd.f32 %v7889_v49, %v2280_v6  ;;  %v6171_v11 = vpop.f32.mrb[10].mxu0 }
 0x204   : > { %v2712_v39 = vmul.f32 0.1, %v2584_v4  ;;  %v2585_v40 = vadd.f32 %v6171_v11, %v7889_v49  ;;  %v2283_v42 = vpop.f32.mrb[11].mxu0  ;;  %6244 = vmatprep.mubr.bf16.mxu0 %v2832_v8  ;;  %vm2648_vm10 = vcmp.gt.f32.partialorder %v2584_v4, 0.0 }
 0x205   : > { %v2710_v43 = vmul.f32 0.1, %v2582_v10  ;;  %v2583_v44 = vadd.f32 %v7889_v49, %v2283_v42  ;;  %6245 = vmatmul.mubr.bf16.gmra.mrb[68].mxu0 %v2833_v0  ;;  %vm2646_vm11 = vcmp.gt.f32.partialorder %v2582_v10, 0.0  ;;  %v7094_v0 = vld [vmem:[%s7869_s27 + $0x90] sm:$0xff]  }
 0x206   : > { %vm2649_vm12 = vcmp.gt.f32.partialorder %v2585_v40, 0.0  ;;  %v2713_v45 = vmul.f32 0.1, %v2585_v40  ;;  %v2776_v48 = vsel %vm2648_vm10, %v2584_v4, %v2712_v39 }
 0x207   : > { %vm2647_vm13 = vcmp.gt.f32.partialorder %v2583_v44, 0.0  ;;  %v2711_v46 = vmul.f32 0.1, %v2583_v44  ;;  %v2774_v53 = vsel %vm2646_vm11, %v2582_v10, %v2710_v43 }
 0x208   : > { %v2777_v50 = vsel %vm2649_vm12, %v2585_v40, %v2713_v45  ;;  %6481 = vmatmul.mubr.msk.bf16.gmra.mrb[32].mxu1 %vm4248_vm1, %v7092_v54 }
 0x209   : > { %v6174_v52 = vpop.f32.mrb[12].mxu0  ;;  %v2775_v55 = vsel %vm2647_vm13, %v2583_v44, %v2711_v46  ;;  %v2835_v56 = vpack.c.bf16 %v2777_v50, %v2776_v48  ;;  %6484 = vmatprep.mubr.msk.bf16.mxu1 %vm4248_vm1, %v7094_v0 }
 0x20a   : > { %v2588_v61 = vadd.f32 %v6174_v52, %v7889_v49  ;;  %v2296_v63 = vpop.f32.mrb[13].mxu0  ;;  %v2834_v1 = vpack.c.bf16 %v2775_v55, %v2774_v53  ;;  %v7096_v53 = vld [vmem:[%s7869_s27 + $0xa0] sm:$0xff]  }
 0x20b   : > { %v2586_v3 = vadd.f32 %v7889_v49, %v2296_v63  ;;  %v6175_v5 = vpop.f32.mrb[14].mxu0 }
 0x20c   : > { %v2716_v7 = vmul.f32 0.1, %v2588_v61  ;;  %v2589_v9 = vadd.f32 %v6175_v5, %v7889_v49  ;;  %v2299_v12 = vpop.f32.mrb[15].mxu0  ;;  %6248 = vmatprep.mubr.bf16.mxu0 %v2834_v1  ;;  %vm2652_vm14 = vcmp.gt.f32.partialorder %v2588_v61, 0.0 }
 0x20d   : > { %v2714_v13 = vmul.f32 0.1, %v2586_v3  ;;  %v2587_v14 = vadd.f32 %v7889_v49, %v2299_v12  ;;  %6249 = vmatmul.mubr.bf16.gmra.mrb[72].mxu0 %v2835_v56  ;;  %vm2650_vm15 = vcmp.gt.f32.partialorder %v2586_v3, 0.0 }
 0x20e   : > { %vm2653_vm0 = vcmp.gt.f32.partialorder %v2589_v9, 0.0  ;;  %v2717_v15 = vmul.f32 0.1, %v2589_v9  ;;  %v2780_v17 = vsel %vm2652_vm14, %v2588_v61, %v2716_v7 }
 0x20f   : > { %vm2651_vm2 = vcmp.gt.f32.partialorder %v2587_v14, 0.0  ;;  %v2715_v16 = vmul.f32 0.1, %v2587_v14  ;;  %v2778_v21 = vsel %vm2650_vm15, %v2586_v3, %v2714_v13 }
 0x210   : > { %v2781_v18 = vsel %vm2653_vm0, %v2589_v9, %v2717_v15  ;;  %6485 = vmatmul.mubr.msk.bf16.gmra.mrb[36].mxu1 %vm4248_vm1, %v7095_v47 }
 0x211   : > { %v6178_v20 = vpop.f32.mrb[16].mxu0  ;;  %v2779_v22 = vsel %vm2651_vm2, %v2587_v14, %v2715_v16  ;;  %v2837_v23 = vpack.c.bf16 %v2781_v18, %v2780_v17  ;;  %6488 = vmatprep.mubr.msk.bf16.mxu1 %vm4248_vm1, %v7096_v53  ;;  %v7097_v16 = vld [vmem:[%s7869_s27 + $0xa8] sm:$0xff]  }
 0x212   : > { %v2592_v25 = vadd.f32 %v6178_v20, %v7889_v49  ;;  %v2312_v26 = vpop.f32.mrb[17].mxu0  ;;  %v2836_v27 = vpack.c.bf16 %v2779_v22, %v2778_v21  ;;  %v7099_v21 = vld [vmem:[%s7869_s27 + $0xb0] sm:$0xff]  }
 0x213   : > { %v2590_v28 = vadd.f32 %v7889_v49, %v2312_v26  ;;  %v6179_v29 = vpop.f32.mrb[18].mxu0 }
 0x214   : > { %v2720_v30 = vmul.f32 0.1, %v2592_v25  ;;  %v2593_v31 = vadd.f32 %v6179_v29, %v7889_v49  ;;  %v2315_v32 = vpop.f32.mrb[19].mxu0  ;;  %6252 = vmatprep.mubr.bf16.mxu0 %v2836_v27  ;;  %vm2656_vm3 = vcmp.gt.f32.partialorder %v2592_v25, 0.0 }
 0x215   : > { %v2718_v33 = vmul.f32 0.1, %v2590_v28  ;;  %v2591_v34 = vadd.f32 %v7889_v49, %v2315_v32  ;;  %6253 = vmatmul.mubr.bf16.gmra.mrb[76].mxu0 %v2837_v23  ;;  %vm2654_vm4 = vcmp.gt.f32.partialorder %v2590_v28, 0.0 }
 0x216   : > { %vm2657_vm5 = vcmp.gt.f32.partialorder %v2593_v31, 0.0  ;;  %v2721_v35 = vmul.f32 0.1, %v2593_v31  ;;  %v2784_v38 = vsel %vm2656_vm3, %v2592_v25, %v2720_v30 }
 0x217   : > { %vm2655_vm6 = vcmp.gt.f32.partialorder %v2591_v34, 0.0  ;;  %v2719_v36 = vmul.f32 0.1, %v2591_v34  ;;  %v2782_v58 = vsel %vm2654_vm4, %v2590_v28, %v2718_v33 }
 0x218   : > { %v2785_v41 = vsel %vm2657_vm5, %v2593_v31, %v2721_v35  ;;  %6489 = vmatmul.mubr.msk.bf16.gmra.mrb[40].mxu1 %vm4248_vm1, %v7097_v16 }
 0x219   : > { %v6182_v57 = vpop.f32.mrb[20].mxu0  ;;  %v2783_v60 = vsel %vm2655_vm6, %v2591_v34, %v2719_v36  ;;  %v2839_v62 = vpack.c.bf16 %v2785_v41, %v2784_v38  ;;  %6492 = vmatprep.mubr.msk.bf16.mxu1 %vm4248_vm1, %v7099_v21  ;;  %v7100_v36 = vld [vmem:[%s7869_s27 + $0xb8] sm:$0xff]  }
 0x21a   : > { %v2596_v2 = vadd.f32 %v6182_v57, %v7889_v49  ;;  %v2328_v4 = vpop.f32.mrb[21].mxu0  ;;  %v2838_v6 = vpack.c.bf16 %v2783_v60, %v2782_v58  ;;  %v7101_v58 = vld [vmem:[%s7869_s27 + $0xc0] sm:$0xff]  }
 0x21b   : > { %v2594_v8 = vadd.f32 %v7889_v49, %v2328_v4  ;;  %v6183_v10 = vpop.f32.mrb[22].mxu0 }
 0x21c   : > { %v2724_v11 = vmul.f32 0.1, %v2596_v2  ;;  %v2597_v37 = vadd.f32 %v6183_v10, %v7889_v49  ;;  %v2331_v39 = vpop.f32.mrb[23].mxu0  ;;  %6256 = vmatprep.mubr.bf16.mxu0 %v2838_v6  ;;  %vm2660_vm7 = vcmp.gt.f32.partialorder %v2596_v2, 0.0 }
 0x21d   : > { %v2722_v40 = vmul.f32 0.1, %v2594_v8  ;;  %v2595_v42 = vadd.f32 %v7889_v49, %v2331_v39  ;;  %6257 = vmatmul.mubr.bf16.gmra.mrb[80].mxu0 %v2839_v62  ;;  %vm2658_vm8 = vcmp.gt.f32.partialorder %v2594_v8, 0.0 }
 0x21e   : > { %vm2661_vm9 = vcmp.gt.f32.partialorder %v2597_v37, 0.0  ;;  %v2725_v43 = vmul.f32 0.1, %v2597_v37  ;;  %v2788_v45 = vsel %vm2660_vm7, %v2596_v2, %v2724_v11 }
 0x21f   : > { %vm2659_vm10 = vcmp.gt.f32.partialorder %v2595_v42, 0.0  ;;  %v2723_v44 = vmul.f32 0.1, %v2595_v42  ;;  %v2786_v50 = vsel %vm2658_vm8, %v2594_v8, %v2722_v40 }
 0x220   : > { %v2789_v46 = vsel %vm2661_vm9, %v2597_v37, %v2725_v43  ;;  %6493 = vmatmul.mubr.msk.bf16.gmra.mrb[44].mxu1 %vm4248_vm1, %v7100_v36 }
 0x221   : > { %v6186_v48 = vpop.f32.mrb[24].mxu0  ;;  %v2787_v51 = vsel %vm2659_vm10, %v2595_v42, %v2723_v44  ;;  %v2841_v52 = vpack.c.bf16 %v2789_v46, %v2788_v45  ;;  %6496 = vmatprep.mubr.msk.bf16.mxu1 %vm4248_vm1, %v7101_v58  ;;  %v7102_v44 = vld [vmem:[%s7869_s27 + $0xc8] sm:$0xff]  }
 0x222   : > { %v2600_v55 = vadd.f32 %v6186_v48, %v7889_v49  ;;  %v2344_v56 = vpop.f32.mrb[25].mxu0  ;;  %v2840_v59 = vpack.c.bf16 %v2787_v51, %v2786_v50  ;;  %v7104_v50 = vld [vmem:[%s7869_s27 + $0xd0] sm:$0xff]  }
 0x223   : > { %v2598_v61 = vadd.f32 %v7889_v49, %v2344_v56  ;;  %v6187_v63 = vpop.f32.mrb[26].mxu0 }
 0x224   : > { %v2728_v1 = vmul.f32 0.1, %v2600_v55  ;;  %v2601_v3 = vadd.f32 %v6187_v63, %v7889_v49  ;;  %v2347_v5 = vpop.f32.mrb[27].mxu0  ;;  %6260 = vmatprep.mubr.bf16.mxu0 %v2840_v59  ;;  %vm2664_vm11 = vcmp.gt.f32.partialorder %v2600_v55, 0.0 }
 0x225   : > { %v2726_v7 = vmul.f32 0.1, %v2598_v61  ;;  %v2599_v9 = vadd.f32 %v7889_v49, %v2347_v5  ;;  %6261 = vmatmul.mubr.bf16.gmra.mrb[84].mxu0 %v2841_v52  ;;  %vm2662_vm12 = vcmp.gt.f32.partialorder %v2598_v61, 0.0 }
 0x226   : > { %vm2665_vm13 = vcmp.gt.f32.partialorder %v2601_v3, 0.0  ;;  %v2729_v12 = vmul.f32 0.1, %v2601_v3  ;;  %v2792_v14 = vsel %vm2664_vm11, %v2600_v55, %v2728_v1 }
 0x227   : > { %vm2663_vm14 = vcmp.gt.f32.partialorder %v2599_v9, 0.0  ;;  %v2727_v13 = vmul.f32 0.1, %v2599_v9  ;;  %v2790_v18 = vsel %vm2662_vm12, %v2598_v61, %v2726_v7 }
 0x228   : > { %v2793_v15 = vsel %vm2665_vm13, %v2601_v3, %v2729_v12  ;;  %6497 = vmatmul.mubr.msk.bf16.gmra.mrb[48].mxu1 %vm4248_vm1, %v7102_v44  ;;  %v7109_v44 = vld [vmem:[%s7869_s27 + $0xf0] sm:$0xff]  }
 0x229   : > { %v6190_v17 = vpop.f32.mrb[28].mxu0  ;;  %v2791_v19 = vsel %vm2663_vm14, %v2599_v9, %v2727_v13  ;;  %v2843_v20 = vpack.c.bf16 %v2793_v15, %v2792_v14  ;;  %6500 = vmatprep.mubr.msk.bf16.mxu1 %vm4248_vm1, %v7104_v50  ;;  %v7105_v13 = vld [vmem:[%s7869_s27 + $0xd8] sm:$0xff]  }
 0x22a   : > { %v2604_v22 = vadd.f32 %v6190_v17, %v7889_v49  ;;  %v2360_v23 = vpop.f32.mrb[29].mxu0  ;;  %v2842_v24 = vpack.c.bf16 %v2791_v19, %v2790_v18  ;;  %v7106_v18 = vld [vmem:[%s7869_s27 + $0xe0] sm:$0xff]  }
 0x22b   : > { %v2602_v25 = vadd.f32 %v7889_v49, %v2360_v23  ;;  %v6191_v26 = vpop.f32.mrb[30].mxu0 }
 0x22c   : > { %v2732_v27 = vmul.f32 0.1, %v2604_v22  ;;  %v2605_v28 = vadd.f32 %v6191_v26, %v7889_v49  ;;  %v2363_v29 = vpop.f32.mrb[31].mxu0  ;;  %6264 = vmatprep.mubr.bf16.mxu0 %v2842_v24  ;;  %vm2668_vm15 = vcmp.gt.f32.partialorder %v2604_v22, 0.0 }
 0x22d   : > { %v2730_v30 = vmul.f32 0.1, %v2602_v25  ;;  %v2603_v31 = vadd.f32 %v7889_v49, %v2363_v29  ;;  %6265 = vmatmul.mubr.bf16.gmra.mrb[88].mxu0 %v2843_v20  ;;  %vm2666_vm0 = vcmp.gt.f32.partialorder %v2602_v25, 0.0 }
 0x22e   : > { %vm2669_vm2 = vcmp.gt.f32.partialorder %v2605_v28, 0.0  ;;  %v2733_v32 = vmul.f32 0.1, %v2605_v28  ;;  %v2796_v34 = vsel %vm2668_vm15, %v2604_v22, %v2732_v27 }
 0x22f   : > { %vm2667_vm3 = vcmp.gt.f32.partialorder %v2603_v31, 0.0  ;;  %v2731_v33 = vmul.f32 0.1, %v2603_v31  ;;  %v2794_v41 = vsel %vm2666_vm0, %v2602_v25, %v2730_v30 }
 0x230   : > { %v2797_v35 = vsel %vm2669_vm2, %v2605_v28, %v2733_v32  ;;  %6501 = vmatmul.mubr.msk.bf16.gmra.mrb[52].mxu1 %vm4248_vm1, %v7105_v13 }
 0x231   : > { %v6194_v38 = vpop.f32.mrb[32].mxu0  ;;  %v2795_v54 = vsel %vm2667_vm3, %v2603_v31, %v2731_v33  ;;  %v2845_v57 = vpack.c.bf16 %v2797_v35, %v2796_v34  ;;  %6504 = vmatprep.mubr.msk.bf16.mxu1 %vm4248_vm1, %v7106_v18  ;;  %v7107_v33 = vld [vmem:[%s7869_s27 + $0xe8] sm:$0xff]  }
 0x232   : > { %v2608_v60 = vadd.f32 %v6194_v38, %v7889_v49  ;;  %v2376_v62 = vpop.f32.mrb[33].mxu0  ;;  %v2844_v0 = vpack.c.bf16 %v2795_v54, %v2794_v41 }
 0x233   : > { %v2606_v2 = vadd.f32 %v7889_v49, %v2376_v62  ;;  %v6195_v4 = vpop.f32.mrb[34].mxu0 }
 0x234   : > { %v2736_v6 = vmul.f32 0.1, %v2608_v60  ;;  %v2609_v8 = vadd.f32 %v6195_v4, %v7889_v49  ;;  %v2379_v10 = vpop.f32.mrb[35].mxu0  ;;  %6268 = vmatprep.mubr.bf16.mxu0 %v2844_v0  ;;  %vm2672_vm4 = vcmp.gt.f32.partialorder %v2608_v60, 0.0 }
 0x235   : > { %v2734_v11 = vmul.f32 0.1, %v2606_v2  ;;  %v2607_v37 = vadd.f32 %v7889_v49, %v2379_v10  ;;  %6269 = vmatmul.mubr.bf16.gmra.mrb[92].mxu0 %v2845_v57  ;;  %vm2670_vm5 = vcmp.gt.f32.partialorder %v2606_v2, 0.0 }
 0x236   : > { %vm2673_vm6 = vcmp.gt.f32.partialorder %v2609_v8, 0.0  ;;  %v2737_v39 = vmul.f32 0.1, %v2609_v8  ;;  %v2800_v42 = vsel %vm2672_vm4, %v2608_v60, %v2736_v6 }
 0x237   : > { %vm2671_vm7 = vcmp.gt.f32.partialorder %v2607_v37, 0.0  ;;  %v2735_v40 = vmul.f32 0.1, %v2607_v37  ;;  %v2798_v46 = vsel %vm2670_vm5, %v2606_v2, %v2734_v11 }
 0x238   : > { %v2801_v43 = vsel %vm2673_vm6, %v2609_v8, %v2737_v39  ;;  %6505 = vmatmul.mubr.msk.bf16.gmra.mrb[56].mxu1 %vm4248_vm1, %v7107_v33 }
 0x239   : > { %v6198_v45 = vpop.f32.mrb[36].mxu0  ;;  %v2799_v47 = vsel %vm2671_vm7, %v2607_v37, %v2735_v40  ;;  %v2847_v48 = vpack.c.bf16 %v2801_v43, %v2800_v42  ;;  %6508 = vmatprep.mubr.msk.bf16.mxu1 %vm4248_vm1, %v7109_v44 }
 0x23a   : > { %v2612_v51 = vadd.f32 %v6198_v45, %v7889_v49  ;;  %v2392_v52 = vpop.f32.mrb[37].mxu0  ;;  %v2846_v53 = vpack.c.bf16 %v2799_v47, %v2798_v46 }
 0x23b   : > { %v2610_v55 = vadd.f32 %v7889_v49, %v2392_v52  ;;  %v6199_v56 = vpop.f32.mrb[38].mxu0 }
 0x23c   : > { %v2740_v59 = vmul.f32 0.1, %v2612_v51  ;;  %v2613_v61 = vadd.f32 %v6199_v56, %v7889_v49  ;;  %v2395_v63 = vpop.f32.mrb[39].mxu0  ;;  %6272 = vmatprep.mubr.bf16.mxu0 %v2846_v53  ;;  %vm2676_vm8 = vcmp.gt.f32.partialorder %v2612_v51, 0.0 }
 0x23d   : > { %v2738_v1 = vmul.f32 0.1, %v2610_v55  ;;  %v2611_v3 = vadd.f32 %v7889_v49, %v2395_v63  ;;  %6273 = vmatmul.mubr.bf16.gmra.mrb[96].mxu0 %v2847_v48  ;;  %vm2674_vm9 = vcmp.gt.f32.partialorder %v2610_v55, 0.0  ;;  %v7110_v48 = vld [vmem:[%s7869_s27 + $0xf8] sm:$0xff]   ;;  %s7117_s27 = scalar_lea.vmem %s7116_s17, 16384 }
 0x23e   : > { %vm2677_vm10 = vcmp.gt.f32.partialorder %v2613_v61, 0.0  ;;  %v2741_v5 = vmul.f32 0.1, %v2613_v61  ;;  %v2804_v9 = vsel %vm2676_vm8, %v2612_v51, %v2740_v59  ;;  %p7119_p1 = scmp.lt.s32.totalorder %s7117_s27, %s7111_s25 }
 0x23f   : > { %vm2675_vm11 = vcmp.gt.f32.partialorder %v2611_v3, 0.0  ;;  %v2739_v7 = vmul.f32 0.1, %v2611_v3  ;;  %v2802_v15 = vsel %vm2674_vm9, %v2610_v55, %v2738_v1 }
 0x240   : > { %v2805_v12 = vsel %vm2677_vm10, %v2613_v61, %v2741_v5  ;;  %6509 = vmatmul.mubr.msk.bf16.gmra.mrb[60].mxu1 %vm4248_vm1, %v7110_v48  ;;  %p7120_p2 = por %p7119_p1, %p7118_p0 }
 0x241   : > { %v6202_v14 = vpop.f32.mrb[40].mxu0  ;;  %v2803_v16 = vsel %vm2675_vm11, %v2611_v3, %v2739_v7  ;;  %v2849_v17 = vpack.c.bf16 %v2805_v12, %v2804_v9 }
 0x242   : > { %v2616_v19 = vadd.f32 %v6202_v14, %v7889_v49  ;;  %v2408_v20 = vpop.f32.mrb[41].mxu0  ;;  %v2848_v21 = vpack.c.bf16 %v2803_v16, %v2802_v15  ;;  %p7121_p3 = pnand %p7120_p2, %p7114_p13 }
 0x243   : > { %v2614_v22 = vadd.f32 %v7889_v49, %v2408_v20  ;;  %v6203_v23 = vpop.f32.mrb[42].mxu0 }
 0x244   : > { %v2744_v24 = vmul.f32 0.1, %v2616_v19  ;;  %v2617_v25 = vadd.f32 %v6203_v23, %v7889_v49  ;;  %v2411_v26 = vpop.f32.mrb[43].mxu0  ;;  %6276 = vmatprep.mubr.bf16.mxu0 %v2848_v21  ;;  %vm2680_vm12 = vcmp.gt.f32.partialorder %v2616_v19, 0.0 }
 0x245   : > { %v2742_v27 = vmul.f32 0.1, %v2614_v22  ;;  %v2615_v28 = vadd.f32 %v7889_v49, %v2411_v26  ;;  %6277 = vmatmul.mubr.bf16.gmra.mrb[100].mxu0 %v2849_v17  ;;  %vm2678_vm13 = vcmp.gt.f32.partialorder %v2614_v22, 0.0 }
 0x246   : > { %vm2681_vm14 = vcmp.gt.f32.partialorder %v2617_v25, 0.0  ;;  %v2745_v29 = vmul.f32 0.1, %v2617_v25  ;;  %v2808_v31 = vsel %vm2680_vm12, %v2616_v19, %v2744_v24 }
 0x247   : > { %vm2679_vm15 = vcmp.gt.f32.partialorder %v2615_v28, 0.0  ;;  %v2743_v30 = vmul.f32 0.1, %v2615_v28  ;;  %v2806_v35 = vsel %vm2678_vm13, %v2614_v22, %v2742_v27 }
 0x248   : > { %v2809_v32 = vsel %vm2681_vm14, %v2617_v25, %v2745_v29 }
 0x249   : > { %v6206_v34 = vpop.f32.mrb[44].mxu0  ;;  %v2807_v36 = vsel %vm2679_vm15, %v2615_v28, %v2743_v30  ;;  %v2851_v38 = vpack.c.bf16 %v2809_v32, %v2808_v31 }
 0x24a   : > { %v2620_v41 = vadd.f32 %v6206_v34, %v7889_v49  ;;  %v2424_v54 = vpop.f32.mrb[45].mxu0  ;;  %v2850_v57 = vpack.c.bf16 %v2807_v36, %v2806_v35 }
 0x24b   : > { %v2618_v58 = vadd.f32 %v7889_v49, %v2424_v54  ;;  %v6207_v60 = vpop.f32.mrb[46].mxu0 }
 0x24c   : > { %v2748_v62 = vmul.f32 0.1, %v2620_v41  ;;  %v2621_v0 = vadd.f32 %v6207_v60, %v7889_v49  ;;  %v2427_v2 = vpop.f32.mrb[47].mxu0  ;;  %6280 = vmatprep.mubr.bf16.mxu0 %v2850_v57  ;;  %vm2684_vm0 = vcmp.gt.f32.partialorder %v2620_v41, 0.0 }
 0x24d   : > { %v2746_v4 = vmul.f32 0.1, %v2618_v58  ;;  %v2619_v6 = vadd.f32 %v7889_v49, %v2427_v2  ;;  %6281 = vmatmul.mubr.bf16.gmra.mrb[104].mxu0 %v2851_v38  ;;  %vm2682_vm2 = vcmp.gt.f32.partialorder %v2618_v58, 0.0 }
 0x24e   : > { %vm2685_vm3 = vcmp.gt.f32.partialorder %v2621_v0, 0.0  ;;  %v2749_v8 = vmul.f32 0.1, %v2621_v0  ;;  %v2812_v11 = vsel %vm2684_vm0, %v2620_v41, %v2748_v62 }
 0x24f   : > { %vm2683_vm4 = vcmp.gt.f32.partialorder %v2619_v6, 0.0  ;;  %v2747_v10 = vmul.f32 0.1, %v2619_v6  ;;  %v2810_v40 = vsel %vm2682_vm2, %v2618_v58, %v2746_v4 }
 0x250   : > { %v2813_v37 = vsel %vm2685_vm3, %v2621_v0, %v2749_v8 }
 0x251   : > { %v6210_v39 = vpop.f32.mrb[48].mxu0  ;;  %v2811_v42 = vsel %vm2683_vm4, %v2619_v6, %v2747_v10  ;;  %v2853_v43 = vpack.c.bf16 %v2813_v37, %v2812_v11 }
 0x252   : > { %v2624_v45 = vadd.f32 %v6210_v39, %v7889_v49  ;;  %v2440_v46 = vpop.f32.mrb[49].mxu0  ;;  %v2852_v47 = vpack.c.bf16 %v2811_v42, %v2810_v40 }
 0x253   : > { %v2622_v50 = vadd.f32 %v7889_v49, %v2440_v46  ;;  %v6211_v51 = vpop.f32.mrb[50].mxu0 }
 0x254   : > { %v2752_v52 = vmul.f32 0.1, %v2624_v45  ;;  %v2625_v53 = vadd.f32 %v6211_v51, %v7889_v49  ;;  %v2443_v55 = vpop.f32.mrb[51].mxu0  ;;  %6284 = vmatprep.mubr.bf16.mxu0 %v2852_v47  ;;  %vm2688_vm5 = vcmp.gt.f32.partialorder %v2624_v45, 0.0 }
 0x255   : > { %v2750_v56 = vmul.f32 0.1, %v2622_v50  ;;  %v2623_v59 = vadd.f32 %v7889_v49, %v2443_v55  ;;  %6285 = vmatmul.mubr.bf16.gmra.mrb[108].mxu0 %v2853_v43  ;;  %vm2686_vm6 = vcmp.gt.f32.partialorder %v2622_v50, 0.0 }
 0x256   : > { %vm2689_vm7 = vcmp.gt.f32.partialorder %v2625_v53, 0.0  ;;  %v2753_v61 = vmul.f32 0.1, %v2625_v53  ;;  %v2816_v1 = vsel %vm2688_vm5, %v2624_v45, %v2752_v52 }
 0x257   : > { %vm2687_vm8 = vcmp.gt.f32.partialorder %v2623_v59, 0.0  ;;  %v2751_v63 = vmul.f32 0.1, %v2623_v59  ;;  %v2814_v7 = vsel %vm2686_vm6, %v2622_v50, %v2750_v56 }
 0x258   : > { %v2817_v3 = vsel %vm2689_vm7, %v2625_v53, %v2753_v61 }
 0x259   : > { %v6214_v5 = vpop.f32.mrb[52].mxu0  ;;  %v2815_v9 = vsel %vm2687_vm8, %v2623_v59, %v2751_v63  ;;  %v2855_v12 = vpack.c.bf16 %v2817_v3, %v2816_v1  ;;  %v8031_v59 = vld [vmem:[%s8296_s9] ss:$0 sm:$0xff] }
 0x25a   : > { %v2628_v13 = vadd.f32 %v6214_v5, %v7889_v49  ;;  %v2456_v14 = vpop.f32.mrb[53].mxu0  ;;  %v2854_v15 = vpack.c.bf16 %v2815_v9, %v2814_v7 }
 0x25b   : > { %v2626_v16 = vadd.f32 %v7889_v49, %v2456_v14  ;;  %v6215_v17 = vpop.f32.mrb[54].mxu0 }
 0x25c   : > { %v2756_v18 = vmul.f32 0.1, %v2628_v13  ;;  %v2629_v19 = vadd.f32 %v6215_v17, %v7889_v49  ;;  %v2459_v20 = vpop.f32.mrb[55].mxu0  ;;  %6288 = vmatprep.mubr.bf16.mxu0 %v2854_v15  ;;  %vm2692_vm1 = vcmp.gt.f32.partialorder %v2628_v13, 0.0 }
 0x25d   : > { %v2754_v21 = vmul.f32 0.1, %v2626_v16  ;;  %v2627_v22 = vadd.f32 %v7889_v49, %v2459_v20  ;;  %6289 = vmatmul.mubr.bf16.gmra.mrb[112].mxu0 %v2855_v12  ;;  %vm2690_vm9 = vcmp.gt.f32.partialorder %v2626_v16, 0.0 }
 0x25e   : > { %vm2693_vm10 = vcmp.gt.f32.partialorder %v2629_v19, 0.0  ;;  %v2757_v23 = vmul.f32 0.1, %v2629_v19  ;;  %v2820_v25 = vsel %vm2692_vm1, %v2628_v13, %v2756_v18 }
 0x25f   : > { %vm2691_vm11 = vcmp.gt.f32.partialorder %v2627_v22, 0.0  ;;  %v2755_v24 = vmul.f32 0.1, %v2627_v22  ;;  %v2818_v28 = vsel %vm2690_vm9, %v2626_v16, %v2754_v21 }
 0x260   : > { %v2821_v26 = vsel %vm2693_vm10, %v2629_v19, %v2757_v23 }
 0x261   : > { %v6218_v27 = vpop.f32.mrb[56].mxu0  ;;  %v2819_v29 = vsel %vm2691_vm11, %v2627_v22, %v2755_v24  ;;  %v2857_v30 = vpack.c.bf16 %v2821_v26, %v2820_v25 }
 0x262   : > { %v2632_v31 = vadd.f32 %v6218_v27, %v7889_v49  ;;  %v2472_v32 = vpop.f32.mrb[57].mxu0  ;;  %v2856_v33 = vpack.c.bf16 %v2819_v29, %v2818_v28 }
 0x263   : > { %v2630_v34 = vadd.f32 %v7889_v49, %v2472_v32  ;;  %v6219_v35 = vpop.f32.mrb[58].mxu0 }
 0x264   : > { %v2760_v36 = vmul.f32 0.1, %v2632_v31  ;;  %v2633_v38 = vadd.f32 %v6219_v35, %v7889_v49  ;;  %v2475_v41 = vpop.f32.mrb[59].mxu0  ;;  %6292 = vmatprep.mubr.bf16.mxu0 %v2856_v33  ;;  %vm2696_vm12 = vcmp.gt.f32.partialorder %v2632_v31, 0.0 }
 0x265   : > { %v2758_v54 = vmul.f32 0.1, %v2630_v34  ;;  %v2631_v57 = vadd.f32 %v7889_v49, %v2475_v41  ;;  %6293 = vmatmul.mubr.bf16.gmra.mrb[116].mxu0 %v2857_v30  ;;  %vm2694_vm13 = vcmp.gt.f32.partialorder %v2630_v34, 0.0 }
 0x266   : > { %vm2697_vm14 = vcmp.gt.f32.partialorder %v2633_v38, 0.0  ;;  %v2761_v58 = vmul.f32 0.1, %v2633_v38  ;;  %v2824_v62 = vsel %vm2696_vm12, %v2632_v31, %v2760_v36 }
 0x267   : > { %vm2695_vm15 = vcmp.gt.f32.partialorder %v2631_v57, 0.0  ;;  %v2759_v60 = vmul.f32 0.1, %v2631_v57  ;;  %v2822_v4 = vsel %vm2694_vm13, %v2630_v34, %v2758_v54 }
 0x268   : > { %v2825_v0 = vsel %vm2697_vm14, %v2633_v38, %v2761_v58 }
 0x269   : > { %v6222_v2 = vpop.f32.mrb[60].mxu0  ;;  %v2823_v6 = vsel %vm2695_vm15, %v2631_v57, %v2759_v60  ;;  %v2859_v8 = vpack.c.bf16 %v2825_v0, %v2824_v62 }
 0x26a   : > { %v2636_v10 = vadd.f32 %v6222_v2, %v7889_v49  ;;  %v2488_v11 = vpop.f32.mrb[61].mxu0  ;;  %v2858_v37 = vpack.c.bf16 %v2823_v6, %v2822_v4 }
 0x26b   : > { %v2634_v39 = vadd.f32 %v7889_v49, %v2488_v11  ;;  %v6223_v40 = vpop.f32.mrb[62].mxu0 }
 0x26c   : > { %v2764_v42 = vmul.f32 0.1, %v2636_v10  ;;  %v2637_v43 = vadd.f32 %v6223_v40, %v7889_v49  ;;  %v2491_v44 = vpop.f32.mrb[63].mxu0  ;;  %6296 = vmatprep.mubr.bf16.mxu0 %v2858_v37  ;;  %vm2700_vm0 = vcmp.gt.f32.partialorder %v2636_v10, 0.0 }
 0x26d   : > { %v2762_v45 = vmul.f32 0.1, %v2634_v39  ;;  %v2635_v46 = vadd.f32 %v7889_v49, %v2491_v44  ;;  %6297 = vmatmul.mubr.bf16.gmra.mrb[120].mxu0 %v2859_v8  ;;  %vm2698_vm2 = vcmp.gt.f32.partialorder %v2634_v39, 0.0 }
 0x26e   : > { %vm2701_vm3 = vcmp.gt.f32.partialorder %v2637_v43, 0.0  ;;  %v2765_v47 = vmul.f32 0.1, %v2637_v43  ;;  %v2828_v50 = vsel %vm2700_vm0, %v2636_v10, %v2764_v42 }
 0x26f   : > { %vm2699_vm4 = vcmp.gt.f32.partialorder %v2635_v46, 0.0  ;;  %v2763_v48 = vmul.f32 0.1, %v2635_v46  ;;  %v2826_v52 = vsel %vm2698_vm2, %v2634_v39, %v2762_v45 }
 0x270   : > { %v2829_v51 = vsel %vm2701_vm3, %v2637_v43, %v2765_v47 }
 0x271   : > { %v2827_v53 = vsel %vm2699_vm4, %v2635_v46, %v2763_v48  ;;  %v2861_v55 = vpack.c.bf16 %v2829_v51, %v2828_v50 }
 0x272   : > { %v2860_v56 = vpack.c.bf16 %v2827_v53, %v2826_v52 }
 0x274   : > { %6300 = vmatprep.mubr.bf16.mxu0 %v2860_v56 }
 0x275   : > { %6301 = vmatmul.mubr.bf16.gmra.mrb[124].mxu0 %v2861_v55 }
 0x2d0   : > { %v6242_v49 = vpop.f32.mrb[64].mxu0 }
 0x2d1   : > { %v2976_v61 = vadd.f32 %v6242_v49, %v8031_v59  ;;  %v2967_v63 = vpop.f32.mrb[65].mxu0 }
 0x2d2   : > { %v2968_v1 = vadd.f32 %v8031_v59, %v2967_v63  ;;  %v6243_v3 = vpop.f32.mrb[66].mxu0 }
 0x2d3   : > { %v3288_v5 = vmul.f32 0.1, %v2976_v61  ;;  %v2979_v7 = vadd.f32 %v6243_v3, %v8031_v59  ;;  %v2970_v9 = vpop.f32.mrb[67].mxu0  ;;  %vm3224_vm5 = vcmp.gt.f32.partialorder %v2976_v61, 0.0 }
 0x2d4   : > { %v3286_v12 = vmul.f32 0.1, %v2968_v1  ;;  %v2971_v13 = vadd.f32 %v8031_v59, %v2970_v9  ;;  %vm3222_vm6 = vcmp.gt.f32.partialorder %v2968_v1, 0.0 }
 0x2d5   : > { %vm3225_vm7 = vcmp.gt.f32.partialorder %v2979_v7, 0.0  ;;  %v3289_v14 = vmul.f32 0.1, %v2979_v7  ;;  %v3352_v16 = vsel %vm3224_vm5, %v2976_v61, %v3288_v5 }
 0x2d6   : > { %vm3223_vm8 = vcmp.gt.f32.partialorder %v2971_v13, 0.0  ;;  %v3287_v15 = vmul.f32 0.1, %v2971_v13  ;;  %v3350_v20 = vsel %vm3222_vm6, %v2968_v1, %v3286_v12 }
 0x2d7   : > { %v3353_v17 = vsel %vm3225_vm7, %v2979_v7, %v3289_v14 }
 0x2d8   : > { %v3415_v18 = vpack.c.bf16 %v3353_v17, %v3352_v16  ;;  %v6246_v19 = vpop.f32.mrb[68].mxu0  ;;  %v3351_v21 = vsel %vm3223_vm8, %v2971_v13, %v3287_v15 }
 0x2d9   : > { %v2992_v22 = vadd.f32 %v6246_v19, %v8031_v59  ;;  %v2983_v23 = vpop.f32.mrb[69].mxu0  ;;  %v3414_v24 = vpack.c.bf16 %v3351_v21, %v3350_v20 }
 0x2da   : > { %v2984_v25 = vadd.f32 %v8031_v59, %v2983_v23  ;;  %v6247_v26 = vpop.f32.mrb[70].mxu0 }
 0x2db   : > { %v3292_v27 = vmul.f32 0.1, %v2992_v22  ;;  %v2995_v28 = vadd.f32 %v6247_v26, %v8031_v59  ;;  %v2986_v29 = vpop.f32.mrb[71].mxu0  ;;  %6528 = vmatprep.mubr.bf16.mxu1 %v3414_v24  ;;  %vm3228_vm1 = vcmp.gt.f32.partialorder %v2992_v22, 0.0 }
 0x2dc   : > { %v3290_v30 = vmul.f32 0.1, %v2984_v25  ;;  %v2987_v31 = vadd.f32 %v8031_v59, %v2986_v29  ;;  %6529 = vmatmul.mubr.bf16.vlgmr.msra.gmra.mrb[0].mxu1 %v3415_v18  ;;  %vm3226_vm9 = vcmp.gt.f32.partialorder %v2984_v25, 0.0 }
 0x2dd   : > { %vm3229_vm10 = vcmp.gt.f32.partialorder %v2995_v28, 0.0  ;;  %v3293_v32 = vmul.f32 0.1, %v2995_v28  ;;  %v3356_v34 = vsel %vm3228_vm1, %v2992_v22, %v3292_v27 }
 0x2de   : > { %vm3227_vm11 = vcmp.gt.f32.partialorder %v2987_v31, 0.0  ;;  %v3291_v33 = vmul.f32 0.1, %v2987_v31  ;;  %v3354_v38 = vsel %vm3226_vm9, %v2984_v25, %v3290_v30 }
 0x2df   : > { %v3357_v35 = vsel %vm3229_vm10, %v2995_v28, %v3293_v32 }
 0x2e0   : > { %v6250_v36 = vpop.f32.mrb[72].mxu0  ;;  %v3355_v41 = vsel %vm3227_vm11, %v2987_v31, %v3291_v33  ;;  %v3417_v54 = vpack.c.bf16 %v3357_v35, %v3356_v34 }
 0x2e1   : > { %v3008_v57 = vadd.f32 %v6250_v36, %v8031_v59  ;;  %v2999_v58 = vpop.f32.mrb[73].mxu0  ;;  %v3416_v60 = vpack.c.bf16 %v3355_v41, %v3354_v38 }
 0x2e2   : > { %v3000_v62 = vadd.f32 %v8031_v59, %v2999_v58  ;;  %v6251_v0 = vpop.f32.mrb[74].mxu0 }
 0x2e3   : > { %v3296_v2 = vmul.f32 0.1, %v3008_v57  ;;  %v3011_v4 = vadd.f32 %v6251_v0, %v8031_v59  ;;  %v3002_v6 = vpop.f32.mrb[75].mxu0  ;;  %6532 = vmatprep.mubr.bf16.mxu1 %v3416_v60  ;;  %vm3232_vm12 = vcmp.gt.f32.partialorder %v3008_v57, 0.0 }
 0x2e4   : > { %v3294_v8 = vmul.f32 0.1, %v3000_v62  ;;  %v3003_v10 = vadd.f32 %v8031_v59, %v3002_v6  ;;  %6533 = vmatmul.mubr.bf16.gmra.mrb[4].mxu1 %v3417_v54  ;;  %vm3230_vm13 = vcmp.gt.f32.partialorder %v3000_v62, 0.0 }
 0x2e5   : > { %vm3233_vm14 = vcmp.gt.f32.partialorder %v3011_v4, 0.0  ;;  %v3297_v11 = vmul.f32 0.1, %v3011_v4  ;;  %v3360_v39 = vsel %vm3232_vm12, %v3008_v57, %v3296_v2 }
 0x2e6   : > { %vm3231_vm15 = vcmp.gt.f32.partialorder %v3003_v10, 0.0  ;;  %v3295_v37 = vmul.f32 0.1, %v3003_v10  ;;  %v3358_v43 = vsel %vm3230_vm13, %v3000_v62, %v3294_v8 }
 0x2e7   : > { %v3361_v40 = vsel %vm3233_vm14, %v3011_v4, %v3297_v11 }
 0x2e8   : > { %v6254_v42 = vpop.f32.mrb[76].mxu0  ;;  %v3359_v44 = vsel %vm3231_vm15, %v3003_v10, %v3295_v37  ;;  %v3419_v45 = vpack.c.bf16 %v3361_v40, %v3360_v39 }
 0x2e9   : > { %v3024_v46 = vadd.f32 %v6254_v42, %v8031_v59  ;;  %v3015_v47 = vpop.f32.mrb[77].mxu0  ;;  %v3418_v48 = vpack.c.bf16 %v3359_v44, %v3358_v43 }
 0x2ea   : > { %v3016_v50 = vadd.f32 %v8031_v59, %v3015_v47  ;;  %v6255_v51 = vpop.f32.mrb[78].mxu0 }
 0x2eb   : > { %v3300_v52 = vmul.f32 0.1, %v3024_v46  ;;  %v3027_v53 = vadd.f32 %v6255_v51, %v8031_v59  ;;  %v3018_v55 = vpop.f32.mrb[79].mxu0  ;;  %6536 = vmatprep.mubr.bf16.mxu1 %v3418_v48  ;;  %vm3236_vm0 = vcmp.gt.f32.partialorder %v3024_v46, 0.0 }
 0x2ec   : > { %v3298_v56 = vmul.f32 0.1, %v3016_v50  ;;  %v3019_v49 = vadd.f32 %v8031_v59, %v3018_v55  ;;  %6537 = vmatmul.mubr.bf16.gmra.mrb[8].mxu1 %v3419_v45  ;;  %vm3234_vm2 = vcmp.gt.f32.partialorder %v3016_v50, 0.0 }
 0x2ed   : > { %vm3237_vm3 = vcmp.gt.f32.partialorder %v3027_v53, 0.0  ;;  %v3301_v61 = vmul.f32 0.1, %v3027_v53  ;;  %v3364_v1 = vsel %vm3236_vm0, %v3024_v46, %v3300_v52 }
 0x2ee   : > { %vm3235_vm4 = vcmp.gt.f32.partialorder %v3019_v49, 0.0  ;;  %v3299_v63 = vmul.f32 0.1, %v3019_v49  ;;  %v3362_v7 = vsel %vm3234_vm2, %v3016_v50, %v3298_v56 }
 0x2ef   : > { %v3365_v3 = vsel %vm3237_vm3, %v3027_v53, %v3301_v61 }
 0x2f0   : > { %v6258_v5 = vpop.f32.mrb[80].mxu0  ;;  %v3363_v9 = vsel %vm3235_vm4, %v3019_v49, %v3299_v63  ;;  %v3421_v12 = vpack.c.bf16 %v3365_v3, %v3364_v1 }
 0x2f1   : > { %v3040_v13 = vadd.f32 %v6258_v5, %v8031_v59  ;;  %v3031_v14 = vpop.f32.mrb[81].mxu0  ;;  %v3420_v15 = vpack.c.bf16 %v3363_v9, %v3362_v7 }
 0x2f2   : > { %v3032_v16 = vadd.f32 %v8031_v59, %v3031_v14  ;;  %v6259_v17 = vpop.f32.mrb[82].mxu0 }
 0x2f3   : > { %v3304_v18 = vmul.f32 0.1, %v3040_v13  ;;  %v3043_v19 = vadd.f32 %v6259_v17, %v8031_v59  ;;  %v3034_v20 = vpop.f32.mrb[83].mxu0  ;;  %6540 = vmatprep.mubr.bf16.mxu1 %v3420_v15  ;;  %vm3240_vm5 = vcmp.gt.f32.partialorder %v3040_v13, 0.0 }
 0x2f4   : > { %v3302_v21 = vmul.f32 0.1, %v3032_v16  ;;  %v3035_v22 = vadd.f32 %v8031_v59, %v3034_v20  ;;  %6541 = vmatmul.mubr.bf16.gmra.mrb[12].mxu1 %v3421_v12  ;;  %vm3238_vm6 = vcmp.gt.f32.partialorder %v3032_v16, 0.0 }
 0x2f5   : > { %vm3241_vm7 = vcmp.gt.f32.partialorder %v3043_v19, 0.0  ;;  %v3305_v23 = vmul.f32 0.1, %v3043_v19  ;;  %v3368_v25 = vsel %vm3240_vm5, %v3040_v13, %v3304_v18 }
 0x2f6   : > { %vm3239_vm8 = vcmp.gt.f32.partialorder %v3035_v22, 0.0  ;;  %v3303_v24 = vmul.f32 0.1, %v3035_v22  ;;  %v3366_v28 = vsel %vm3238_vm6, %v3032_v16, %v3302_v21 }
 0x2f7   : > { %v3369_v26 = vsel %vm3241_vm7, %v3043_v19, %v3305_v23 }
 0x2f8   : > { %v6262_v27 = vpop.f32.mrb[84].mxu0  ;;  %v3367_v29 = vsel %vm3239_vm8, %v3035_v22, %v3303_v24  ;;  %v3423_v30 = vpack.c.bf16 %v3369_v26, %v3368_v25 }
 0x2f9   : > { %v3056_v31 = vadd.f32 %v6262_v27, %v8031_v59  ;;  %v3047_v32 = vpop.f32.mrb[85].mxu0  ;;  %v3422_v33 = vpack.c.bf16 %v3367_v29, %v3366_v28 }
 0x2fa   : > { %v3048_v34 = vadd.f32 %v8031_v59, %v3047_v32  ;;  %v6263_v35 = vpop.f32.mrb[86].mxu0 }
 0x2fb   : > { %v3308_v36 = vmul.f32 0.1, %v3056_v31  ;;  %v3059_v38 = vadd.f32 %v6263_v35, %v8031_v59  ;;  %v3050_v41 = vpop.f32.mrb[87].mxu0  ;;  %6544 = vmatprep.mubr.bf16.mxu1 %v3422_v33  ;;  %vm3244_vm1 = vcmp.gt.f32.partialorder %v3056_v31, 0.0 }
 0x2fc   : > { %v3306_v54 = vmul.f32 0.1, %v3048_v34  ;;  %v3051_v57 = vadd.f32 %v8031_v59, %v3050_v41  ;;  %6545 = vmatmul.mubr.bf16.gmra.mrb[16].mxu1 %v3423_v30  ;;  %vm3242_vm9 = vcmp.gt.f32.partialorder %v3048_v34, 0.0 }
 0x2fd   : > { %vm3245_vm10 = vcmp.gt.f32.partialorder %v3059_v38, 0.0  ;;  %v3309_v58 = vmul.f32 0.1, %v3059_v38  ;;  %v3372_v62 = vsel %vm3244_vm1, %v3056_v31, %v3308_v36 }
 0x2fe   : > { %vm3243_vm11 = vcmp.gt.f32.partialorder %v3051_v57, 0.0  ;;  %v3307_v60 = vmul.f32 0.1, %v3051_v57  ;;  %v3370_v4 = vsel %vm3242_vm9, %v3048_v34, %v3306_v54 }
 0x2ff   : > { %v3373_v0 = vsel %vm3245_vm10, %v3059_v38, %v3309_v58 }
 0x300   : > { %v6266_v2 = vpop.f32.mrb[88].mxu0  ;;  %v3371_v6 = vsel %vm3243_vm11, %v3051_v57, %v3307_v60  ;;  %v3425_v8 = vpack.c.bf16 %v3373_v0, %v3372_v62 }
 0x301   : > { %v3072_v10 = vadd.f32 %v6266_v2, %v8031_v59  ;;  %v3063_v11 = vpop.f32.mrb[89].mxu0  ;;  %v3424_v37 = vpack.c.bf16 %v3371_v6, %v3370_v4 }
 0x302   : > { %v3064_v39 = vadd.f32 %v8031_v59, %v3063_v11  ;;  %v6267_v40 = vpop.f32.mrb[90].mxu0 }
 0x303   : > { %v3312_v42 = vmul.f32 0.1, %v3072_v10  ;;  %v3075_v43 = vadd.f32 %v6267_v40, %v8031_v59  ;;  %v3066_v44 = vpop.f32.mrb[91].mxu0  ;;  %6548 = vmatprep.mubr.bf16.mxu1 %v3424_v37  ;;  %vm3248_vm12 = vcmp.gt.f32.partialorder %v3072_v10, 0.0 }
 0x304   : > { %v3310_v45 = vmul.f32 0.1, %v3064_v39  ;;  %v3067_v46 = vadd.f32 %v8031_v59, %v3066_v44  ;;  %6549 = vmatmul.mubr.bf16.gmra.mrb[20].mxu1 %v3425_v8  ;;  %vm3246_vm13 = vcmp.gt.f32.partialorder %v3064_v39, 0.0 }
 0x305   : > { %vm3249_vm14 = vcmp.gt.f32.partialorder %v3075_v43, 0.0  ;;  %v3313_v47 = vmul.f32 0.1, %v3075_v43  ;;  %v3376_v50 = vsel %vm3248_vm12, %v3072_v10, %v3312_v42 }
 0x306   : > { %vm3247_vm15 = vcmp.gt.f32.partialorder %v3067_v46, 0.0  ;;  %v3311_v48 = vmul.f32 0.1, %v3067_v46  ;;  %v3374_v53 = vsel %vm3246_vm13, %v3064_v39, %v3310_v45 }
 0x307   : > { %v3377_v51 = vsel %vm3249_vm14, %v3075_v43, %v3313_v47 }
 0x308   : > { %v6270_v52 = vpop.f32.mrb[92].mxu0  ;;  %v3375_v55 = vsel %vm3247_vm15, %v3067_v46, %v3311_v48  ;;  %v3427_v56 = vpack.c.bf16 %v3377_v51, %v3376_v50 }
 0x309   : > { %v3088_v49 = vadd.f32 %v6270_v52, %v8031_v59  ;;  %v3079_v61 = vpop.f32.mrb[93].mxu0  ;;  %v3426_v63 = vpack.c.bf16 %v3375_v55, %v3374_v53 }
 0x30a   : > { %v3080_v1 = vadd.f32 %v8031_v59, %v3079_v61  ;;  %v6271_v3 = vpop.f32.mrb[94].mxu0 }
 0x30b   : > { %v3316_v5 = vmul.f32 0.1, %v3088_v49  ;;  %v3091_v7 = vadd.f32 %v6271_v3, %v8031_v59  ;;  %v3082_v9 = vpop.f32.mrb[95].mxu0  ;;  %6552 = vmatprep.mubr.bf16.mxu1 %v3426_v63  ;;  %vm3252_vm0 = vcmp.gt.f32.partialorder %v3088_v49, 0.0 }
 0x30c   : > { %v3314_v12 = vmul.f32 0.1, %v3080_v1  ;;  %v3083_v13 = vadd.f32 %v8031_v59, %v3082_v9  ;;  %6553 = vmatmul.mubr.bf16.gmra.mrb[24].mxu1 %v3427_v56  ;;  %vm3250_vm2 = vcmp.gt.f32.partialorder %v3080_v1, 0.0 }
 0x30d   : > { %vm3253_vm3 = vcmp.gt.f32.partialorder %v3091_v7, 0.0  ;;  %v3317_v14 = vmul.f32 0.1, %v3091_v7  ;;  %v3380_v16 = vsel %vm3252_vm0, %v3088_v49, %v3316_v5 }
 0x30e   : > { %vm3251_vm4 = vcmp.gt.f32.partialorder %v3083_v13, 0.0  ;;  %v3315_v15 = vmul.f32 0.1, %v3083_v13  ;;  %v3378_v19 = vsel %vm3250_vm2, %v3080_v1, %v3314_v12 }
 0x30f   : > { %v3381_v17 = vsel %vm3253_vm3, %v3091_v7, %v3317_v14 }
 0x310   : > { %v6274_v18 = vpop.f32.mrb[96].mxu0  ;;  %v3379_v20 = vsel %vm3251_vm4, %v3083_v13, %v3315_v15  ;;  %v3429_v21 = vpack.c.bf16 %v3381_v17, %v3380_v16 }
 0x311   : > { %v3104_v22 = vadd.f32 %v6274_v18, %v8031_v59  ;;  %v3095_v23 = vpop.f32.mrb[97].mxu0  ;;  %v3428_v24 = vpack.c.bf16 %v3379_v20, %v3378_v19 }
 0x312   : > { %v3096_v25 = vadd.f32 %v8031_v59, %v3095_v23  ;;  %v6275_v26 = vpop.f32.mrb[98].mxu0 }
 0x313   : > { %v3320_v27 = vmul.f32 0.1, %v3104_v22  ;;  %v3107_v28 = vadd.f32 %v6275_v26, %v8031_v59  ;;  %v3098_v29 = vpop.f32.mrb[99].mxu0  ;;  %6556 = vmatprep.mubr.bf16.mxu1 %v3428_v24  ;;  %vm3256_vm5 = vcmp.gt.f32.partialorder %v3104_v22, 0.0 }
 0x314   : > { %v3318_v30 = vmul.f32 0.1, %v3096_v25  ;;  %v3099_v31 = vadd.f32 %v8031_v59, %v3098_v29  ;;  %6557 = vmatmul.mubr.bf16.gmra.mrb[28].mxu1 %v3429_v21  ;;  %vm3254_vm6 = vcmp.gt.f32.partialorder %v3096_v25, 0.0 }
 0x315   : > { %vm3257_vm7 = vcmp.gt.f32.partialorder %v3107_v28, 0.0  ;;  %v3321_v32 = vmul.f32 0.1, %v3107_v28  ;;  %v3384_v34 = vsel %vm3256_vm5, %v3104_v22, %v3320_v27 }
 0x316   : > { %vm3255_vm8 = vcmp.gt.f32.partialorder %v3099_v31, 0.0  ;;  %v3319_v33 = vmul.f32 0.1, %v3099_v31  ;;  %v3382_v38 = vsel %vm3254_vm6, %v3096_v25, %v3318_v30 }
 0x317   : > { %v3385_v35 = vsel %vm3257_vm7, %v3107_v28, %v3321_v32 }
 0x318   : > { %v6278_v36 = vpop.f32.mrb[100].mxu0  ;;  %v3383_v41 = vsel %vm3255_vm8, %v3099_v31, %v3319_v33  ;;  %v3431_v54 = vpack.c.bf16 %v3385_v35, %v3384_v34 }
 0x319   : > { %v3120_v57 = vadd.f32 %v6278_v36, %v8031_v59  ;;  %v3111_v58 = vpop.f32.mrb[101].mxu0  ;;  %v3430_v60 = vpack.c.bf16 %v3383_v41, %v3382_v38 }
 0x31a   : > { %v3112_v62 = vadd.f32 %v8031_v59, %v3111_v58  ;;  %v6279_v0 = vpop.f32.mrb[102].mxu0 }
 0x31b   : > { %v3324_v2 = vmul.f32 0.1, %v3120_v57  ;;  %v3123_v4 = vadd.f32 %v6279_v0, %v8031_v59  ;;  %v3114_v6 = vpop.f32.mrb[103].mxu0  ;;  %6560 = vmatprep.mubr.bf16.mxu1 %v3430_v60  ;;  %vm3260_vm1 = vcmp.gt.f32.partialorder %v3120_v57, 0.0 }
 0x31c   : > { %v3322_v8 = vmul.f32 0.1, %v3112_v62  ;;  %v3115_v10 = vadd.f32 %v8031_v59, %v3114_v6  ;;  %6561 = vmatmul.mubr.bf16.gmra.mrb[32].mxu1 %v3431_v54  ;;  %vm3258_vm9 = vcmp.gt.f32.partialorder %v3112_v62, 0.0 }
 0x31d   : > { %vm3261_vm10 = vcmp.gt.f32.partialorder %v3123_v4, 0.0  ;;  %v3325_v11 = vmul.f32 0.1, %v3123_v4  ;;  %v3388_v39 = vsel %vm3260_vm1, %v3120_v57, %v3324_v2 }
 0x31e   : > { %vm3259_vm11 = vcmp.gt.f32.partialorder %v3115_v10, 0.0  ;;  %v3323_v37 = vmul.f32 0.1, %v3115_v10  ;;  %v3386_v43 = vsel %vm3258_vm9, %v3112_v62, %v3322_v8 }
 0x31f   : > { %v3389_v40 = vsel %vm3261_vm10, %v3123_v4, %v3325_v11 }
 0x320   : > { %v6282_v42 = vpop.f32.mrb[104].mxu0  ;;  %v3387_v44 = vsel %vm3259_vm11, %v3115_v10, %v3323_v37  ;;  %v3433_v45 = vpack.c.bf16 %v3389_v40, %v3388_v39 }
 0x321   : > { %v3136_v46 = vadd.f32 %v6282_v42, %v8031_v59  ;;  %v3127_v47 = vpop.f32.mrb[105].mxu0  ;;  %v3432_v48 = vpack.c.bf16 %v3387_v44, %v3386_v43 }
 0x322   : > { %v3128_v50 = vadd.f32 %v8031_v59, %v3127_v47  ;;  %v6283_v51 = vpop.f32.mrb[106].mxu0 }
 0x323   : > { %v3328_v52 = vmul.f32 0.1, %v3136_v46  ;;  %v3139_v53 = vadd.f32 %v6283_v51, %v8031_v59  ;;  %v3130_v55 = vpop.f32.mrb[107].mxu0  ;;  %6564 = vmatprep.mubr.bf16.mxu1 %v3432_v48  ;;  %vm3264_vm12 = vcmp.gt.f32.partialorder %v3136_v46, 0.0 }
 0x324   : > { %v3326_v56 = vmul.f32 0.1, %v3128_v50  ;;  %v3131_v49 = vadd.f32 %v8031_v59, %v3130_v55  ;;  %6565 = vmatmul.mubr.bf16.gmra.mrb[36].mxu1 %v3433_v45  ;;  %vm3262_vm13 = vcmp.gt.f32.partialorder %v3128_v50, 0.0 }
 0x325   : > { %vm3265_vm14 = vcmp.gt.f32.partialorder %v3139_v53, 0.0  ;;  %v3329_v61 = vmul.f32 0.1, %v3139_v53  ;;  %v3392_v1 = vsel %vm3264_vm12, %v3136_v46, %v3328_v52 }
 0x326   : > { %vm3263_vm15 = vcmp.gt.f32.partialorder %v3131_v49, 0.0  ;;  %v3327_v63 = vmul.f32 0.1, %v3131_v49  ;;  %v3390_v7 = vsel %vm3262_vm13, %v3128_v50, %v3326_v56 }
 0x327   : > { %v3393_v3 = vsel %vm3265_vm14, %v3139_v53, %v3329_v61 }
 0x328   : > { %v6286_v5 = vpop.f32.mrb[108].mxu0  ;;  %v3391_v9 = vsel %vm3263_vm15, %v3131_v49, %v3327_v63  ;;  %v3435_v12 = vpack.c.bf16 %v3393_v3, %v3392_v1 }
 0x329   : > { %v3152_v13 = vadd.f32 %v6286_v5, %v8031_v59  ;;  %v3143_v14 = vpop.f32.mrb[109].mxu0  ;;  %v3434_v15 = vpack.c.bf16 %v3391_v9, %v3390_v7 }
 0x32a   : > { %v3144_v16 = vadd.f32 %v8031_v59, %v3143_v14  ;;  %v6287_v17 = vpop.f32.mrb[110].mxu0 }
 0x32b   : > { %v3332_v18 = vmul.f32 0.1, %v3152_v13  ;;  %v3155_v19 = vadd.f32 %v6287_v17, %v8031_v59  ;;  %v3146_v20 = vpop.f32.mrb[111].mxu0  ;;  %6568 = vmatprep.mubr.bf16.mxu1 %v3434_v15  ;;  %vm3268_vm0 = vcmp.gt.f32.partialorder %v3152_v13, 0.0 }
 0x32c   : > { %v3330_v21 = vmul.f32 0.1, %v3144_v16  ;;  %v3147_v22 = vadd.f32 %v8031_v59, %v3146_v20  ;;  %6569 = vmatmul.mubr.bf16.gmra.mrb[40].mxu1 %v3435_v12  ;;  %vm3266_vm2 = vcmp.gt.f32.partialorder %v3144_v16, 0.0 }
 0x32d   : > { %vm3269_vm3 = vcmp.gt.f32.partialorder %v3155_v19, 0.0  ;;  %v3333_v23 = vmul.f32 0.1, %v3155_v19  ;;  %v3396_v25 = vsel %vm3268_vm0, %v3152_v13, %v3332_v18 }
 0x32e   : > { %vm3267_vm4 = vcmp.gt.f32.partialorder %v3147_v22, 0.0  ;;  %v3331_v24 = vmul.f32 0.1, %v3147_v22  ;;  %v3394_v28 = vsel %vm3266_vm2, %v3144_v16, %v3330_v21 }
 0x32f   : > { %v3397_v26 = vsel %vm3269_vm3, %v3155_v19, %v3333_v23 }
 0x330   : > { %v6290_v27 = vpop.f32.mrb[112].mxu0  ;;  %v3395_v29 = vsel %vm3267_vm4, %v3147_v22, %v3331_v24  ;;  %v3437_v30 = vpack.c.bf16 %v3397_v26, %v3396_v25 }
 0x331   : > { %v3168_v31 = vadd.f32 %v6290_v27, %v8031_v59  ;;  %v3159_v32 = vpop.f32.mrb[113].mxu0  ;;  %v3436_v33 = vpack.c.bf16 %v3395_v29, %v3394_v28 }
 0x332   : > { %v3160_v34 = vadd.f32 %v8031_v59, %v3159_v32  ;;  %v6291_v35 = vpop.f32.mrb[114].mxu0 }
 0x333   : > { %v3336_v36 = vmul.f32 0.1, %v3168_v31  ;;  %v3171_v38 = vadd.f32 %v6291_v35, %v8031_v59  ;;  %v3162_v41 = vpop.f32.mrb[115].mxu0  ;;  %6572 = vmatprep.mubr.bf16.mxu1 %v3436_v33  ;;  %vm3272_vm5 = vcmp.gt.f32.partialorder %v3168_v31, 0.0 }
 0x334   : > { %v3334_v54 = vmul.f32 0.1, %v3160_v34  ;;  %v3163_v57 = vadd.f32 %v8031_v59, %v3162_v41  ;;  %6573 = vmatmul.mubr.bf16.gmra.mrb[44].mxu1 %v3437_v30  ;;  %vm3270_vm6 = vcmp.gt.f32.partialorder %v3160_v34, 0.0 }
 0x335   : > { %vm3273_vm7 = vcmp.gt.f32.partialorder %v3171_v38, 0.0  ;;  %v3337_v58 = vmul.f32 0.1, %v3171_v38  ;;  %v3400_v62 = vsel %vm3272_vm5, %v3168_v31, %v3336_v36 }
 0x336   : > { %vm3271_vm8 = vcmp.gt.f32.partialorder %v3163_v57, 0.0  ;;  %v3335_v60 = vmul.f32 0.1, %v3163_v57  ;;  %v3398_v4 = vsel %vm3270_vm6, %v3160_v34, %v3334_v54 }
 0x337   : > { %v3401_v0 = vsel %vm3273_vm7, %v3171_v38, %v3337_v58 }
 0x338   : > { %v6294_v2 = vpop.f32.mrb[116].mxu0  ;;  %v3399_v6 = vsel %vm3271_vm8, %v3163_v57, %v3335_v60  ;;  %v3439_v8 = vpack.c.bf16 %v3401_v0, %v3400_v62 }
 0x339   : > { %v3184_v10 = vadd.f32 %v6294_v2, %v8031_v59  ;;  %v3175_v11 = vpop.f32.mrb[117].mxu0  ;;  %v3438_v37 = vpack.c.bf16 %v3399_v6, %v3398_v4 }
 0x33a   : > { %v3176_v39 = vadd.f32 %v8031_v59, %v3175_v11  ;;  %v6295_v40 = vpop.f32.mrb[118].mxu0 }
 0x33b   : > { %v3340_v42 = vmul.f32 0.1, %v3184_v10  ;;  %v3187_v43 = vadd.f32 %v6295_v40, %v8031_v59  ;;  %v3178_v44 = vpop.f32.mrb[119].mxu0  ;;  %6576 = vmatprep.mubr.bf16.mxu1 %v3438_v37  ;;  %vm3276_vm1 = vcmp.gt.f32.partialorder %v3184_v10, 0.0 }
 0x33c   : > { %v3338_v45 = vmul.f32 0.1, %v3176_v39  ;;  %v3179_v46 = vadd.f32 %v8031_v59, %v3178_v44  ;;  %6577 = vmatmul.mubr.bf16.gmra.mrb[48].mxu1 %v3439_v8  ;;  %vm3274_vm9 = vcmp.gt.f32.partialorder %v3176_v39, 0.0 }
 0x33d   : > { %vm3277_vm10 = vcmp.gt.f32.partialorder %v3187_v43, 0.0  ;;  %v3341_v47 = vmul.f32 0.1, %v3187_v43  ;;  %v3404_v50 = vsel %vm3276_vm1, %v3184_v10, %v3340_v42 }
 0x33e   : > { %vm3275_vm11 = vcmp.gt.f32.partialorder %v3179_v46, 0.0  ;;  %v3339_v48 = vmul.f32 0.1, %v3179_v46  ;;  %v3402_v53 = vsel %vm3274_vm9, %v3176_v39, %v3338_v45 }
 0x33f   : > { %v3405_v51 = vsel %vm3277_vm10, %v3187_v43, %v3341_v47 }
 0x340   : > { %v6298_v52 = vpop.f32.mrb[120].mxu0  ;;  %v3403_v55 = vsel %vm3275_vm11, %v3179_v46, %v3339_v48  ;;  %v3441_v56 = vpack.c.bf16 %v3405_v51, %v3404_v50 }
 0x341   : > { %v3200_v49 = vadd.f32 %v6298_v52, %v8031_v59  ;;  %v3191_v61 = vpop.f32.mrb[121].mxu0  ;;  %v3440_v63 = vpack.c.bf16 %v3403_v55, %v3402_v53 }
 0x342   : > { %v3192_v1 = vadd.f32 %v8031_v59, %v3191_v61  ;;  %v6299_v3 = vpop.f32.mrb[122].mxu0 }
 0x343   : > { %v3344_v5 = vmul.f32 0.1, %v3200_v49  ;;  %v3203_v7 = vadd.f32 %v6299_v3, %v8031_v59  ;;  %v3194_v9 = vpop.f32.mrb[123].mxu0  ;;  %6580 = vmatprep.mubr.bf16.mxu1 %v3440_v63  ;;  %vm3280_vm12 = vcmp.gt.f32.partialorder %v3200_v49, 0.0 }
 0x344   : > { %v3342_v12 = vmul.f32 0.1, %v3192_v1  ;;  %v3195_v13 = vadd.f32 %v8031_v59, %v3194_v9  ;;  %6581 = vmatmul.mubr.bf16.gmra.mrb[52].mxu1 %v3441_v56  ;;  %vm3278_vm13 = vcmp.gt.f32.partialorder %v3192_v1, 0.0 }
 0x345   : > { %vm3281_vm14 = vcmp.gt.f32.partialorder %v3203_v7, 0.0  ;;  %v3345_v14 = vmul.f32 0.1, %v3203_v7  ;;  %v3408_v16 = vsel %vm3280_vm12, %v3200_v49, %v3344_v5 }
 0x346   : > { %vm3279_vm15 = vcmp.gt.f32.partialorder %v3195_v13, 0.0  ;;  %v3343_v15 = vmul.f32 0.1, %v3195_v13  ;;  %v3406_v19 = vsel %vm3278_vm13, %v3192_v1, %v3342_v12 }
 0x347   : > { %v3409_v17 = vsel %vm3281_vm14, %v3203_v7, %v3345_v14 }
 0x348   : > { %v6302_v18 = vpop.f32.mrb[124].mxu0  ;;  %v3407_v20 = vsel %vm3279_vm15, %v3195_v13, %v3343_v15  ;;  %v3443_v21 = vpack.c.bf16 %v3409_v17, %v3408_v16 }
 0x349   : > { %v3216_v22 = vadd.f32 %v6302_v18, %v8031_v59  ;;  %v3207_v23 = vpop.f32.mrb[125].mxu0  ;;  %v3442_v24 = vpack.c.bf16 %v3407_v20, %v3406_v19 }
 0x34a   : > { %v3208_v25 = vadd.f32 %v8031_v59, %v3207_v23  ;;  %v6303_v26 = vpop.f32.mrb[126].mxu0 }
 0x34b   : > { %v3348_v27 = vmul.f32 0.1, %v3216_v22  ;;  %v3219_v28 = vadd.f32 %v6303_v26, %v8031_v59  ;;  %v3210_v29 = vpop.f32.mrb[127].mxu0  ;;  %6584 = vmatprep.mubr.bf16.mxu1 %v3442_v24  ;;  %vm3284_vm0 = vcmp.gt.f32.partialorder %v3216_v22, 0.0 }
 0x34c   : > { %v3346_v30 = vmul.f32 0.1, %v3208_v25  ;;  %v3211_v31 = vadd.f32 %v8031_v59, %v3210_v29  ;;  %6585 = vmatmul.mubr.bf16.gmra.mrb[56].mxu1 %v3443_v21  ;;  %vm3282_vm2 = vcmp.gt.f32.partialorder %v3208_v25, 0.0  ;;  %v8103_v59 = vld [vmem:[%s8301_s14] ss:$0 sm:$0xff] }
 0x34d   : > { %vm3285_vm3 = vcmp.gt.f32.partialorder %v3219_v28, 0.0  ;;  %v3349_v32 = vmul.f32 0.1, %v3219_v28  ;;  %v3412_v34 = vsel %vm3284_vm0, %v3216_v22, %v3348_v27 }
 0x34e   : > { %vm3283_vm4 = vcmp.gt.f32.partialorder %v3211_v31, 0.0  ;;  %v3347_v33 = vmul.f32 0.1, %v3211_v31  ;;  %v3410_v36 = vsel %vm3282_vm2, %v3208_v25, %v3346_v30 }
 0x34f   : > { %v3413_v35 = vsel %vm3285_vm3, %v3219_v28, %v3349_v32 }
 0x350   : > { %v3411_v38 = vsel %vm3283_vm4, %v3211_v31, %v3347_v33  ;;  %v3445_v41 = vpack.c.bf16 %v3413_v35, %v3412_v34 }
 0x351   : > { %v3444_v54 = vpack.c.bf16 %v3411_v38, %v3410_v36 }
 0x353   : > { %6588 = vmatprep.mubr.bf16.mxu1 %v3444_v54 }
 0x354   : > { %6589 = vmatmul.mubr.bf16.gmra.mrb[60].mxu1 %v3445_v41 }
 0x3af   : > { %v6530_v57 = vpop.f32.mrb[0].mxu1 }
 0x3b0   : > { %v5124_v58 = vadd.f32 %v6530_v57, %v8103_v59  ;;  %v4796_v60 = vpop.f32.mrb[1].mxu1 }
 0x3b1   : > { %v5122_v62 = vadd.f32 %v8103_v59, %v4796_v60  ;;  %v6531_v0 = vpop.f32.mrb[2].mxu1 }
 0x3b2   : > { %5188 = vst [vmem:[%s8107_s24 + $0x10] sm:$0xff] %v5124_v58  ;;  %v5125_v2 = vadd.f32 %v6531_v0, %v8103_v59  ;;  %v4799_v4 = vpop.f32.mrb[3].mxu1 }
 0x3b3   : > { %5186 = vst [vmem:[%s8107_s24] sm:$0xff] %v5122_v62  ;;  %v5123_v6 = vadd.f32 %v8103_v59, %v4799_v4 }
 0x3b4   : > { %5189 = vst [vmem:[%s8107_s24 + $0x18] sm:$0xff] %v5125_v2 }
 0x3b5   : > { %5187 = vst [vmem:[%s8107_s24 + $0x8] sm:$0xff] %v5123_v6 }
 0x3b7   : > { %v6534_v8 = vpop.f32.mrb[4].mxu1 }
 0x3b8   : > { %v5128_v10 = vadd.f32 %v6534_v8, %v8103_v59  ;;  %v4812_v11 = vpop.f32.mrb[5].mxu1 }
 0x3b9   : > { %v5126_v37 = vadd.f32 %v8103_v59, %v4812_v11  ;;  %v6535_v39 = vpop.f32.mrb[6].mxu1 }
 0x3ba   : > { %5192 = vst [vmem:[%s8107_s24 + $0x30] sm:$0xff] %v5128_v10  ;;  %v5129_v40 = vadd.f32 %v6535_v39, %v8103_v59  ;;  %v4815_v42 = vpop.f32.mrb[7].mxu1 }
 0x3bb   : > { %5190 = vst [vmem:[%s8107_s24 + $0x20] sm:$0xff] %v5126_v37  ;;  %v5127_v43 = vadd.f32 %v8103_v59, %v4815_v42 }
 0x3bc   : > { %5193 = vst [vmem:[%s8107_s24 + $0x38] sm:$0xff] %v5129_v40 }
 0x3bd   : > { %5191 = vst [vmem:[%s8107_s24 + $0x28] sm:$0xff] %v5127_v43 }
 0x3bf   : > { %v6538_v44 = vpop.f32.mrb[8].mxu1 }
 0x3c0   : > { %v5132_v45 = vadd.f32 %v6538_v44, %v8103_v59  ;;  %v4828_v46 = vpop.f32.mrb[9].mxu1 }
 0x3c1   : > { %v5130_v47 = vadd.f32 %v8103_v59, %v4828_v46  ;;  %v6539_v48 = vpop.f32.mrb[10].mxu1 }
 0x3c2   : > { %5196 = vst [vmem:[%s8107_s24 + $0x50] sm:$0xff] %v5132_v45  ;;  %v5133_v50 = vadd.f32 %v6539_v48, %v8103_v59  ;;  %v4831_v51 = vpop.f32.mrb[11].mxu1 }
 0x3c3   : > { %5194 = vst [vmem:[%s8107_s24 + $0x40] sm:$0xff] %v5130_v47  ;;  %v5131_v52 = vadd.f32 %v8103_v59, %v4831_v51 }
 0x3c4   : > { %5197 = vst [vmem:[%s8107_s24 + $0x58] sm:$0xff] %v5133_v50 }
 0x3c5   : > { %5195 = vst [vmem:[%s8107_s24 + $0x48] sm:$0xff] %v5131_v52 }
 0x3c7   : > { %v6542_v53 = vpop.f32.mrb[12].mxu1 }
 0x3c8   : > { %v5136_v55 = vadd.f32 %v6542_v53, %v8103_v59  ;;  %v4844_v56 = vpop.f32.mrb[13].mxu1 }
 0x3c9   : > { %v5134_v49 = vadd.f32 %v8103_v59, %v4844_v56  ;;  %v6543_v61 = vpop.f32.mrb[14].mxu1 }
 0x3ca   : > { %5200 = vst [vmem:[%s8107_s24 + $0x70] sm:$0xff] %v5136_v55  ;;  %v5137_v63 = vadd.f32 %v6543_v61, %v8103_v59  ;;  %v4847_v1 = vpop.f32.mrb[15].mxu1 }
 0x3cb   : > { %5198 = vst [vmem:[%s8107_s24 + $0x60] sm:$0xff] %v5134_v49  ;;  %v5135_v3 = vadd.f32 %v8103_v59, %v4847_v1 }
 0x3cc   : > { %5201 = vst [vmem:[%s8107_s24 + $0x78] sm:$0xff] %v5137_v63 }
 0x3cd   : > { %5199 = vst [vmem:[%s8107_s24 + $0x68] sm:$0xff] %v5135_v3 }
 0x3cf   : > { %v6546_v5 = vpop.f32.mrb[16].mxu1 }
 0x3d0   : > { %v5140_v7 = vadd.f32 %v6546_v5, %v8103_v59  ;;  %v4860_v9 = vpop.f32.mrb[17].mxu1 }
 0x3d1   : > { %v5138_v12 = vadd.f32 %v8103_v59, %v4860_v9  ;;  %v6547_v13 = vpop.f32.mrb[18].mxu1 }
 0x3d2   : > { %5204 = vst [vmem:[%s8107_s24 + $0x90] sm:$0xff] %v5140_v7  ;;  %v5141_v14 = vadd.f32 %v6547_v13, %v8103_v59  ;;  %v4863_v15 = vpop.f32.mrb[19].mxu1 }
 0x3d3   : > { %5202 = vst [vmem:[%s8107_s24 + $0x80] sm:$0xff] %v5138_v12  ;;  %v5139_v16 = vadd.f32 %v8103_v59, %v4863_v15 }
 0x3d4   : > { %5205 = vst [vmem:[%s8107_s24 + $0x98] sm:$0xff] %v5141_v14 }
 0x3d5   : > { %5203 = vst [vmem:[%s8107_s24 + $0x88] sm:$0xff] %v5139_v16 }
 0x3d7   : > { %v6550_v17 = vpop.f32.mrb[20].mxu1 }
 0x3d8   : > { %v5144_v18 = vadd.f32 %v6550_v17, %v8103_v59  ;;  %v4876_v19 = vpop.f32.mrb[21].mxu1 }
 0x3d9   : > { %v5142_v20 = vadd.f32 %v8103_v59, %v4876_v19  ;;  %v6551_v21 = vpop.f32.mrb[22].mxu1 }
 0x3da   : > { %5208 = vst [vmem:[%s8107_s24 + $0xb0] sm:$0xff] %v5144_v18  ;;  %v5145_v22 = vadd.f32 %v6551_v21, %v8103_v59  ;;  %v4879_v23 = vpop.f32.mrb[23].mxu1 }
 0x3db   : > { %5206 = vst [vmem:[%s8107_s24 + $0xa0] sm:$0xff] %v5142_v20  ;;  %v5143_v24 = vadd.f32 %v8103_v59, %v4879_v23 }
 0x3dc   : > { %5209 = vst [vmem:[%s8107_s24 + $0xb8] sm:$0xff] %v5145_v22 }
 0x3dd   : > { %5207 = vst [vmem:[%s8107_s24 + $0xa8] sm:$0xff] %v5143_v24 }
 0x3df   : > { %v6554_v25 = vpop.f32.mrb[24].mxu1 }
 0x3e0   : > { %v5148_v26 = vadd.f32 %v6554_v25, %v8103_v59  ;;  %v4892_v27 = vpop.f32.mrb[25].mxu1 }
 0x3e1   : > { %v5146_v28 = vadd.f32 %v8103_v59, %v4892_v27  ;;  %v6555_v29 = vpop.f32.mrb[26].mxu1 }
 0x3e2   : > { %5212 = vst [vmem:[%s8107_s24 + $0xd0] sm:$0xff] %v5148_v26  ;;  %v5149_v30 = vadd.f32 %v6555_v29, %v8103_v59  ;;  %v4895_v31 = vpop.f32.mrb[27].mxu1 }
 0x3e3   : > { %5210 = vst [vmem:[%s8107_s24 + $0xc0] sm:$0xff] %v5146_v28  ;;  %v5147_v32 = vadd.f32 %v8103_v59, %v4895_v31 }
 0x3e4   : > { %5213 = vst [vmem:[%s8107_s24 + $0xd8] sm:$0xff] %v5149_v30 }
 0x3e5   : > { %5211 = vst [vmem:[%s8107_s24 + $0xc8] sm:$0xff] %v5147_v32 }
 0x3e7   : > { %v6558_v33 = vpop.f32.mrb[28].mxu1 }
 0x3e8   : > { %v5152_v34 = vadd.f32 %v6558_v33, %v8103_v59  ;;  %v4908_v35 = vpop.f32.mrb[29].mxu1 }
 0x3e9   : > { %v5150_v36 = vadd.f32 %v8103_v59, %v4908_v35  ;;  %v6559_v38 = vpop.f32.mrb[30].mxu1 }
 0x3ea   : > { %5216 = vst [vmem:[%s8107_s24 + $0xf0] sm:$0xff] %v5152_v34  ;;  %v5153_v41 = vadd.f32 %v6559_v38, %v8103_v59  ;;  %v4911_v54 = vpop.f32.mrb[31].mxu1 }
 0x3eb   : > { %5214 = vst [vmem:[%s8107_s24 + $0xe0] sm:$0xff] %v5150_v36  ;;  %v5151_v57 = vadd.f32 %v8103_v59, %v4911_v54 }
 0x3ec   : > { %5217 = vst [vmem:[%s8107_s24 + $0xf8] sm:$0xff] %v5153_v41 }
 0x3ed   : > { %5215 = vst [vmem:[%s8107_s24 + $0xe8] sm:$0xff] %v5151_v57 }
 0x3ef   : > { %v6562_v58 = vpop.f32.mrb[32].mxu1 }
 0x3f0   : > { %v5156_v60 = vadd.f32 %v6562_v58, %v8103_v59  ;;  %v4924_v62 = vpop.f32.mrb[33].mxu1 }
 0x3f1   : > { %v5154_v0 = vadd.f32 %v8103_v59, %v4924_v62  ;;  %v6563_v2 = vpop.f32.mrb[34].mxu1 }
 0x3f2   : > { %5220 = vst [vmem:[%s8107_s24 + $0x110] sm:$0xff] %v5156_v60  ;;  %v5157_v4 = vadd.f32 %v6563_v2, %v8103_v59  ;;  %v4927_v6 = vpop.f32.mrb[35].mxu1 }
 0x3f3   : > { %5218 = vst [vmem:[%s8107_s24 + $0x100] sm:$0xff] %v5154_v0  ;;  %v5155_v8 = vadd.f32 %v8103_v59, %v4927_v6 }
 0x3f4   : > { %5221 = vst [vmem:[%s8107_s24 + $0x118] sm:$0xff] %v5157_v4 }
 0x3f5   : > { %5219 = vst [vmem:[%s8107_s24 + $0x108] sm:$0xff] %v5155_v8 }
 0x3f7   : > { %v6566_v10 = vpop.f32.mrb[36].mxu1 }
 0x3f8   : > { %v5160_v11 = vadd.f32 %v6566_v10, %v8103_v59  ;;  %v4940_v37 = vpop.f32.mrb[37].mxu1 }
 0x3f9   : > { %v5158_v39 = vadd.f32 %v8103_v59, %v4940_v37  ;;  %v6567_v40 = vpop.f32.mrb[38].mxu1 }
 0x3fa   : > { %5224 = vst [vmem:[%s8107_s24 + $0x130] sm:$0xff] %v5160_v11  ;;  %v5161_v42 = vadd.f32 %v6567_v40, %v8103_v59  ;;  %v4943_v43 = vpop.f32.mrb[39].mxu1 }
 0x3fb   : > { %5222 = vst [vmem:[%s8107_s24 + $0x120] sm:$0xff] %v5158_v39  ;;  %v5159_v44 = vadd.f32 %v8103_v59, %v4943_v43 }
 0x3fc   : > { %5225 = vst [vmem:[%s8107_s24 + $0x138] sm:$0xff] %v5161_v42 }
 0x3fd   : > { %5223 = vst [vmem:[%s8107_s24 + $0x128] sm:$0xff] %v5159_v44 }
 0x3ff   : > { %v6570_v45 = vpop.f32.mrb[40].mxu1 }
 0x400   : > { %v5164_v46 = vadd.f32 %v6570_v45, %v8103_v59  ;;  %v4956_v47 = vpop.f32.mrb[41].mxu1 }
 0x401   : > { %v5162_v48 = vadd.f32 %v8103_v59, %v4956_v47  ;;  %v6571_v50 = vpop.f32.mrb[42].mxu1 }
 0x402   : > { %5228 = vst [vmem:[%s8107_s24 + $0x150] sm:$0xff] %v5164_v46  ;;  %v5165_v51 = vadd.f32 %v6571_v50, %v8103_v59  ;;  %v4959_v52 = vpop.f32.mrb[43].mxu1 }
 0x403   : > { %5226 = vst [vmem:[%s8107_s24 + $0x140] sm:$0xff] %v5162_v48  ;;  %v5163_v53 = vadd.f32 %v8103_v59, %v4959_v52 }
 0x404   : > { %5229 = vst [vmem:[%s8107_s24 + $0x158] sm:$0xff] %v5165_v51 }
 0x405   : > { %5227 = vst [vmem:[%s8107_s24 + $0x148] sm:$0xff] %v5163_v53 }
 0x407   : > { %v6574_v55 = vpop.f32.mrb[44].mxu1 }
 0x408   : > { %v5168_v56 = vadd.f32 %v6574_v55, %v8103_v59  ;;  %v4972_v49 = vpop.f32.mrb[45].mxu1 }
 0x409   : > { %v5166_v61 = vadd.f32 %v8103_v59, %v4972_v49  ;;  %v6575_v63 = vpop.f32.mrb[46].mxu1 }
 0x40a   : > { %5232 = vst [vmem:[%s8107_s24 + $0x170] sm:$0xff] %v5168_v56  ;;  %v5169_v1 = vadd.f32 %v6575_v63, %v8103_v59  ;;  %v4975_v3 = vpop.f32.mrb[47].mxu1 }
 0x40b   : > { %5230 = vst [vmem:[%s8107_s24 + $0x160] sm:$0xff] %v5166_v61  ;;  %v5167_v5 = vadd.f32 %v8103_v59, %v4975_v3 }
 0x40c   : > { %5233 = vst [vmem:[%s8107_s24 + $0x178] sm:$0xff] %v5169_v1 }
 0x40d   : > { %5231 = vst [vmem:[%s8107_s24 + $0x168] sm:$0xff] %v5167_v5 }
 0x40f   : > { %v6578_v7 = vpop.f32.mrb[48].mxu1 }
 0x410   : > { %v5172_v9 = vadd.f32 %v6578_v7, %v8103_v59  ;;  %v4988_v12 = vpop.f32.mrb[49].mxu1 }
 0x411   : > { %v5170_v13 = vadd.f32 %v8103_v59, %v4988_v12  ;;  %v6579_v14 = vpop.f32.mrb[50].mxu1 }
 0x412   : > { %5236 = vst [vmem:[%s8107_s24 + $0x190] sm:$0xff] %v5172_v9  ;;  %v5173_v15 = vadd.f32 %v6579_v14, %v8103_v59  ;;  %v4991_v16 = vpop.f32.mrb[51].mxu1 }
 0x413   : > { %5234 = vst [vmem:[%s8107_s24 + $0x180] sm:$0xff] %v5170_v13  ;;  %v5171_v17 = vadd.f32 %v8103_v59, %v4991_v16 }
 0x414   : > { %5237 = vst [vmem:[%s8107_s24 + $0x198] sm:$0xff] %v5173_v15 }
 0x415   : > { %5235 = vst [vmem:[%s8107_s24 + $0x188] sm:$0xff] %v5171_v17 }
 0x417   : > { %v6582_v18 = vpop.f32.mrb[52].mxu1 }
 0x418   : > { %v5176_v19 = vadd.f32 %v6582_v18, %v8103_v59  ;;  %v5004_v20 = vpop.f32.mrb[53].mxu1 }
 0x419   : > { %v5174_v21 = vadd.f32 %v8103_v59, %v5004_v20  ;;  %v6583_v22 = vpop.f32.mrb[54].mxu1 }
 0x41a   : > { %5240 = vst [vmem:[%s8107_s24 + $0x1b0] sm:$0xff] %v5176_v19  ;;  %v5177_v23 = vadd.f32 %v6583_v22, %v8103_v59  ;;  %v5007_v24 = vpop.f32.mrb[55].mxu1 }
 0x41b   : > { %5238 = vst [vmem:[%s8107_s24 + $0x1a0] sm:$0xff] %v5174_v21  ;;  %v5175_v25 = vadd.f32 %v8103_v59, %v5007_v24 }
 0x41c   : > { %5241 = vst [vmem:[%s8107_s24 + $0x1b8] sm:$0xff] %v5177_v23 }
 0x41d   : > { %5239 = vst [vmem:[%s8107_s24 + $0x1a8] sm:$0xff] %v5175_v25 }
 0x41f   : > { %v6586_v26 = vpop.f32.mrb[56].mxu1 }
 0x420   : > { %v5180_v27 = vadd.f32 %v6586_v26, %v8103_v59  ;;  %v5020_v28 = vpop.f32.mrb[57].mxu1 }
 0x421   : > { %v5178_v29 = vadd.f32 %v8103_v59, %v5020_v28  ;;  %v6587_v30 = vpop.f32.mrb[58].mxu1 }
 0x422   : > { %5244 = vst [vmem:[%s8107_s24 + $0x1d0] sm:$0xff] %v5180_v27  ;;  %v5181_v31 = vadd.f32 %v6587_v30, %v8103_v59  ;;  %v5023_v32 = vpop.f32.mrb[59].mxu1 }
 0x423   : > { %5242 = vst [vmem:[%s8107_s24 + $0x1c0] sm:$0xff] %v5178_v29  ;;  %v5179_v33 = vadd.f32 %v8103_v59, %v5023_v32 }
 0x424   : > { %5245 = vst [vmem:[%s8107_s24 + $0x1d8] sm:$0xff] %v5181_v31 }
 0x425   : > { %5243 = vst [vmem:[%s8107_s24 + $0x1c8] sm:$0xff] %v5179_v33 }
 0x427   : > { %v6590_v34 = vpop.f32.mrb[60].mxu1 }
 0x428   : > { %v5184_v35 = vadd.f32 %v6590_v34, %v8103_v59  ;;  %v5036_v36 = vpop.f32.mrb[61].mxu1 }
 0x429   : > { %v5182_v38 = vadd.f32 %v8103_v59, %v5036_v36  ;;  %v6591_v41 = vpop.f32.mrb[62].mxu1 }
 0x42a   : > { %5248 = vst [vmem:[%s8107_s24 + $0x1f0] sm:$0xff] %v5184_v35  ;;  %v5185_v54 = vadd.f32 %v6591_v41, %v8103_v59  ;;  %v5039_v57 = vpop.f32.mrb[63].mxu1 }
 0x42b   : > { %5246 = vst [vmem:[%s8107_s24 + $0x1e0] sm:$0xff] %v5182_v38  ;;  %v5183_v58 = vadd.f32 %v8103_v59, %v5039_v57 }
 0x42c   : > { %5249 = vst [vmem:[%s8107_s24 + $0x1f8] sm:$0xff] %v5185_v54 }
 0x42d   : > { %5247 = vst [vmem:[%s8107_s24 + $0x1e8] sm:$0xff] %v5183_v58 }
 0x42e   : > { %7124 = shalt.err (!%p7121_p3)
}
 0x42f   : > { %s7125_s16 = scalar_lea.hbm %s8236_s23, 8192  ;;  %s7129_s26 = scalar_lea.hbm %s8302_s15, 16384 }
 0x430   : > { %p7126_p4 = scmp.ne.s32.totalorder %s8236_s23, %s7125_s16  ;;  %p7130_p9 = scmp.lt.u32.totalorder %s8236_s23, %s8302_s15 }
 0x431   : > { %p7131_p10 = scmp.lt.u32.totalorder %s7129_s26, %s7125_s16  ;;  %p7133_p12 = scmp.lt.u32.totalorder %s7125_s16, %s8236_s23 }
 0x432   : > { %p7127_p7 = pnand %p7126_p4, %p7296_p5 }
 0x433   : > { %p7132_p11 = por %p7131_p10, %p7130_p9 }
 0x434   : > { %p7128_p8 = pneg %p7127_p7 }
 0x435   : > { %p7134_p13 = por %p7133_p12, %p7132_p11 }
 0x437   : > { %p7135_p0 = pnand %p7134_p13, %p7128_p8 }
 0x439   : > { %7138 = shalt.err (!%p7135_p0)
}
 0x43a   : > { %s7176_s25 = smov 128   ;;  %s7177_s27 = smov 8  }
 0x43b   : > { %6912 = dma.vmem_to_hbm [thread:$0]  (%p7296_p5), %s8238_s30, 8192, %s8236_s23, %s8246_s22, %s7176_s25, %s7176_s25, %s7177_s27  }
 0x43c PF: > { %p6918_p1 = scmp.ge.s32.totalorder %s7173_s21, 2  ;;  %s5279_s0 = sand.u32 1, %s7161_s18  }
 0x43d   : > { %s5280_s16 = scalar_lea.sflag [#allocation3], %s5279_s0 }
 0x43e   : > { %p6915_p2 = pnand %p6918_p1, %p7300_p6 }
 0x440   : > { %7156 = dma.done.wait (!%p6915_p2), %s5280_s16, 8192  }
 0x441   : > { %7158 = vsyncadd (!%p6915_p2), %s5280_s16, 4294959104  ;;  %s8313_s21 = sld [smem:[#allocation6_spill]]  ;;  %s8314_s24 = sld [smem:[#allocation5_spill]] }
 0x442   : > { %s8315_s20 = sld [smem:[#allocation7_spill]]  ;;  %s8316_s18 = smov %s7165_s19 }
 0x447   : > { %p25_p3 = scmp.ge.s32.totalorder %s8313_s21, 4   ;;  %s8317_s19 = smov %s8314_s24 }
 0x449   :  { %27 = sbr.rel (!%p25_p3) target bundleno = 5 (0x5), region = 124 }
 0x450   :  { %5285 = vsyncpa [#allocation3], 1 }
 0x451   :  { %5287 = vsyncpa [#allocation3 + $0x1], 1 }

</bundles_post_ra>
